<compile_context>
chip_gen: v6e
topology: v6e:2x2x1
jax: 0.10.0
libtpu: 0.0.40
codegen_flags: <defaults>
</compile_context>

<pallas_src>
import math
import numpy as np
import jax
import jax.numpy as jnp
from jax.experimental import pallas as pl
from jax.experimental.pallas import tpu as pltpu

# ----------------------------- configuration --------------------------------
B = 2              # batch
L = 32             # input sequence length
C = 4              # n_vars
MULT = 2           # configs.GT_pooling_rate[depth]
TOKEN_LEN = 8      # configs.token_len
PATCH = TOKEN_LEN // MULT           # patch_size = 4
D_MODEL = 32       # configs.GT_d_model
D_FF = 64          # configs.GT_d_ff
N_HEADS = 4        # configs.n_heads
E_LAYERS = 2       # configs.GT_e_layers
PRED_LEN = 8       # configs.pred_len
HEAD_DIM = D_MODEL // N_HEADS
N_PATCH = (L // MULT) // PATCH      # patches per series = 4
EPS = 1e-5
# configs.activation='relu', configs.output_attention=False, dropout -> eval

BC = B * C
# GRID=1: single TensorCore chips (v5e/v6e) — all 8 series stacked along the
# sublane axis in one step.  Set GRID=2 on v7x to shard across the 2 cores.
GRID = 1
assert BC % GRID == 0
SERIES_PER_STEP = BC // GRID
TN = SERIES_PER_STEP * N_PATCH      # token rows per grid step (= 64 for GRID=1)
HT = N_HEADS * TN                   # head-stacked rows
HEAD_OUT = 128                      # forecast head padded to one full lane tile
NEG = -1e30

# --- row layout of the packed (N_ROWS32, D_MODEL) small-vector slab ----------
ROW_WEMB = 0                        # rows [0, PATCH): value-embedding weight^T
ROW_POS = ROW_WEMB + PATCH          # rows [PATCH, PATCH+TN): tiled positional emb
ROW_LVEC = ROW_POS + TN             # 6 rows per encoder layer
LV_BO, LV_B2, LV_G1, LV_BE1, LV_G2, LV_BE2 = range(6)
LVEC_ROWS = 6
ROW_GF = ROW_LVEC + LVEC_ROWS * E_LAYERS
ROW_BEF = ROW_GF + 1
N_ROWS32 = ROW_BEF + 1


# ----------------------------- Pallas kernel --------------------------------
def gpht_block_kernel(xp_ref, s32_ref, wqkv_ref, wproj_ref, wffn1_ref,
                      whead_ref, hmask_ref, amask_ref, out_ref):
    # xp_ref   : (1, TN, PATCH)                  pooled patches for this step
    # s32_ref  : (N_ROWS32, D_MODEL)             packed small vectors (see layout)
    # wqkv_ref : (E_LAYERS, D_MODEL+1, 128)      rows 0:D = [Wq^T|Wk^T|Wv^T|0], row D = [bq|bk|bv|0]
    # wproj_ref: (E_LAYERS, D_MODEL+D_FF, D_MODEL) rows 0:D = Wo^T, rows D: = W2^T (pre-transposed)
    # wffn1_ref: (E_LAYERS, D_MODEL+1, D_FF)     rows 0:D = W1^T, row D = b1
    # whead_ref: (D_MODEL+1, HEAD_OUT)           rows 0:D = Wh^T (zero-padded), row D = bh
    # hmask_ref: (HT, D_MODEL)                   0/1 per-head lane mask
    # amask_ref: (HT, TN)                        additive block-diag causal mask (0 / -1e30)
    # out_ref  : (1, TN, HEAD_OUT)
    f32 = jnp.float32

    def dot(a, b):      # a @ b
        return jax.lax.dot_general(a, b, (((1,), (0,)), ((), ())),
                                   preferred_element_type=f32)

    def dot_t(a, b):    # a @ b.T (contract last dims) — activations only
        return jax.lax.dot_general(a, b, (((1,), (1,)), ((), ())),
                                   preferred_element_type=f32)

    def layer_norm(v, g, b):
        mu = jnp.mean(v, axis=-1, keepdims=True)
        var = jnp.mean((v - mu) ** 2, axis=-1, keepdims=True)
        return (v - mu) * jax.lax.rsqrt(var + EPS) * g + b

    s32 = s32_ref[...]                                    # (N_ROWS32, D_MODEL)

    def vrow(r):                                          # (1, D_MODEL) vector
        return s32[r:r + 1, :]

    w_emb = s32[ROW_WEMB:ROW_WEMB + PATCH, :]             # (PATCH, D_MODEL)
    pos = s32[ROW_POS:ROW_POS + TN, :]                    # (TN, D_MODEL)
    head_mask = hmask_ref[...]                            # (HT, D_MODEL)
    add_mask = amask_ref[...]                             # (HT, TN)

    # ---- PatchEmbedding: value embedding + positional embedding ------------
    x = dot(xp_ref[0], w_emb) + pos                       # (TN, D_MODEL)

    scale = 1.0 / math.sqrt(HEAD_DIM)

    # ---- encoder layers ------------------------------------------------------
    for l in range(E_LAYERS):
        base = ROW_LVEC + LVEC_ROWS * l
        wqkv_l = wqkv_ref[l]                              # (D_MODEL+1, 128)
        wproj_l = wproj_ref[l]                            # (D_MODEL+D_FF, D_MODEL)
        wffn1_l = wffn1_ref[l]                            # (D_MODEL+1, D_FF)

        # fused QKV: full 128-lane matmul + one fused (1,128) bias-row add
        qkv = dot(x, wqkv_l[0:D_MODEL, :]) + wqkv_l[D_MODEL:D_MODEL + 1, :]
        q = qkv[:, 0:D_MODEL]
        k = qkv[:, D_MODEL:2 * D_MODEL]
        v = qkv[:, 2 * D_MODEL:3 * D_MODEL]

        # all heads at once: sublane-stack q, lane-mask per head
        q_stack = jnp.concatenate([q] * N_HEADS, axis=0) * head_mask   # (HT, D)
        s = scale * dot_t(q_stack, k) + add_mask                        # (HT, TN)
        s = s - jnp.max(s, axis=-1, keepdims=True)
        p = jnp.exp(s)
        p = p * pl.reciprocal(jnp.sum(p, axis=-1, keepdims=True), approx=True)
        ho = dot(p, v) * head_mask                                      # (HT, D)
        o = ho[0:TN, :]
        for h in range(1, N_HEADS):
            o = o + ho[h * TN:(h + 1) * TN, :]                          # (TN, D)

        attn = dot(o, wproj_l[0:D_MODEL, :]) + vrow(base + LV_BO)
        x = layer_norm(x + attn, vrow(base + LV_G1), vrow(base + LV_BE1))

        # conv1/conv2 are kernel-size-1 Conv1d == per-token linears
        y = jnp.maximum(dot(x, wffn1_l[0:D_MODEL, :])
                        + wffn1_l[D_MODEL:D_MODEL + 1, :], 0.0)         # relu
        y = dot(y, wproj_l[D_MODEL:D_MODEL + D_FF, :]) + vrow(base + LV_B2)
        x = layer_norm(x + y, vrow(base + LV_G2), vrow(base + LV_BE2))

    # ---- final encoder LayerNorm + (padded, lane-dense) forecast head -------
    x = layer_norm(x, vrow(ROW_GF), vrow(ROW_BEF))
    whead = whead_ref[...]                                # (D_MODEL+1, HEAD_OUT)
    out_ref[0] = dot(x, whead[0:D_MODEL, :]) + whead[D_MODEL:D_MODEL + 1, :]


# ----------------------------- host-side glue --------------------------------
def sinusoidal_pe(n, d):
    position = np.arange(n, dtype=np.float32)[:, None]
    div_term = np.exp(np.arange(0, d, 2, dtype=np.float32) * -(math.log(10000.0) / d))
    pe = np.zeros((n, d), dtype=np.float32)
    pe[:, 0::2] = np.sin(position * div_term)
    pe[:, 1::2] = np.cos(position * div_term)
    return jnp.asarray(pe)


def init_params(key):
    ks = iter(jax.random.split(key, 40))

    def nrm(shape):
        return 0.02 * jax.random.normal(next(ks), shape, dtype=jnp.float32)

    p = {}
    p['w_emb'] = nrm((D_MODEL, PATCH))                   # Linear(patch, d_model, bias=False)
    p['wq'] = nrm((E_LAYERS, D_MODEL, D_MODEL)); p['bq'] = nrm((E_LAYERS, D_MODEL))
    p['wk'] = nrm((E_LAYERS, D_MODEL, D_MODEL)); p['bk'] = nrm((E_LAYERS, D_MODEL))
    p['wv'] = nrm((E_LAYERS, D_MODEL, D_MODEL)); p['bv'] = nrm((E_LAYERS, D_MODEL))
    p['wo'] = nrm((E_LAYERS, D_MODEL, D_MODEL)); p['bo'] = nrm((E_LAYERS, D_MODEL))
    p['w1'] = nrm((E_LAYERS, D_FF, D_MODEL));    p['b1'] = nrm((E_LAYERS, D_FF))
    p['w2'] = nrm((E_LAYERS, D_MODEL, D_FF));    p['b2'] = nrm((E_LAYERS, D_MODEL))
    p['g1'] = jnp.ones((E_LAYERS, D_MODEL), jnp.float32)
    p['be1'] = jnp.zeros((E_LAYERS, D_MODEL), jnp.float32)
    p['g2'] = jnp.ones((E_LAYERS, D_MODEL), jnp.float32)
    p['be2'] = jnp.zeros((E_LAYERS, D_MODEL), jnp.float32)
    p['gf'] = jnp.ones((D_MODEL,), jnp.float32)
    p['bef'] = jnp.zeros((D_MODEL,), jnp.float32)
    p['wh'] = nrm((PRED_LEN, D_MODEL)); p['bh'] = nrm((PRED_LEN,))
    return p


def build_masks():
    """Precompute (host-side) the per-head lane mask and additive causal mask."""
    r = np.arange(TN)
    valid = ((r[:, None] // N_PATCH) == (r[None, :] // N_PATCH)) & \
            ((r[:, None] % N_PATCH) >= (r[None, :] % N_PATCH))
    add = np.where(valid, 0.0, NEG).astype(np.float32)               # (TN, TN)
    add_mask = np.tile(add, (N_HEADS, 1))                            # (HT, TN)
    hm = np.zeros((N_HEADS, TN, D_MODEL), np.float32)
    for h in range(N_HEADS):
        hm[h, :, h * HEAD_DIM:(h + 1) * HEAD_DIM] = 1.0
    head_mask = hm.reshape(HT, D_MODEL)
    return jnp.asarray(head_mask), jnp.asarray(add_mask)


def pack_operands(p):
    """Pack all weights/biases into a handful of lane-friendly slabs."""
    pe = sinusoidal_pe(N_PATCH, D_MODEL)
    pos_step = jnp.tile(pe, (SERIES_PER_STEP, 1))          # (TN, D_MODEL)

    # small-vector slab (all rows D_MODEL wide; sliced by static sublane offsets)
    rows = [p['w_emb'].T, pos_step]
    for l in range(E_LAYERS):
        rows += [p['bo'][l][None], p['b2'][l][None],
                 p['g1'][l][None], p['be1'][l][None],
                 p['g2'][l][None], p['be2'][l][None]]
    rows += [p['gf'][None], p['bef'][None]]
    small32 = jnp.concatenate(rows, axis=0)
    assert small32.shape == (N_ROWS32, D_MODEL)

    # QKV slab: rows 0:D = [Wq^T | Wk^T | Wv^T | 0pad], row D = [bq | bk | bv | 0]
    zpad = jnp.zeros((E_LAYERS, D_MODEL, D_MODEL), jnp.float32)
    wqkv_top = jnp.concatenate([jnp.transpose(p['wq'], (0, 2, 1)),
                                jnp.transpose(p['wk'], (0, 2, 1)),
                                jnp.transpose(p['wv'], (0, 2, 1)),
                                zpad], axis=-1)                        # (E, D, 128)
    bias_row = jnp.concatenate([p['bq'], p['bk'], p['bv'],
                                jnp.zeros((E_LAYERS, D_MODEL), jnp.float32)],
                               axis=-1)[:, None, :]                    # (E, 1, 128)
    wqkv = jnp.concatenate([wqkv_top, bias_row], axis=1)               # (E, D+1, 128)

    # projection slab: rows 0:D = Wo^T, rows D:D+D_FF = W2^T (all pre-transposed)
    wproj = jnp.concatenate([jnp.transpose(p['wo'], (0, 2, 1)),
                             jnp.transpose(p['w2'], (0, 2, 1))], axis=1)  # (E, D+D_FF, D)

    # FFN-1 slab: rows 0:D = W1^T, row D = b1
    wffn1 = jnp.concatenate([jnp.transpose(p['w1'], (0, 2, 1)),
                             p['b1'][:, None, :]], axis=1)             # (E, D+1, D_FF)

    # forecast head, zero-padded to 128 lanes for an unmasked epilogue store
    wh_t = jnp.zeros((D_MODEL, HEAD_OUT), jnp.float32).at[:, :PRED_LEN].set(p['wh'].T)
    bh = jnp.zeros((1, HEAD_OUT), jnp.float32).at[:, :PRED_LEN].set(p['bh'][None])
    whead = jnp.concatenate([wh_t, bh], axis=0)
    return small32, wqkv, wproj, wffn1, whead


@jax.jit
def gpht_block_forward(x_enc, params):
    Bb, Ll, Cc = x_enc.shape
    bc = Bb * Cc
    # MaxPool1d(MULT) + unfold done in XLA (trivial fused max); kernel gets a
    # dense patch slab with whole series stacked along sublanes.
    xp = jnp.transpose(x_enc, (0, 2, 1)).reshape(bc, Ll // MULT, MULT).max(axis=-1)
    xp = xp.reshape(GRID, TN, PATCH)

    small32, wqkv, wproj, wffn1, whead = pack_operands(params)
    head_mask, add_mask = build_masks()

    def full_spec(arr):
        n = arr.ndim
        return pl.BlockSpec(arr.shape, lambda i, n=n: (0,) * n)

    out = pl.pallas_call(
        gpht_block_kernel,
        out_shape=jax.ShapeDtypeStruct((GRID, TN, HEAD_OUT), jnp.float32),
        grid_spec=pltpu.PrefetchScalarGridSpec(
            num_scalar_prefetch=0,
            grid=(GRID,),
            in_specs=[pl.BlockSpec((1, TN, PATCH), lambda i: (i, 0, 0)),
                      full_spec(small32), full_spec(wqkv), full_spec(wproj),
                      full_spec(wffn1), full_spec(whead),
                      full_spec(head_mask), full_spec(add_mask)],
            out_specs=pl.BlockSpec((1, TN, HEAD_OUT), lambda i: (i, 0, 0)),
        ),
        compiler_params=pltpu.CompilerParams(
            dimension_semantics=("parallel",)),
    )(xp, small32, wqkv, wproj, wffn1, whead, head_mask, add_mask)

    dec = out.reshape(bc * N_PATCH, HEAD_OUT)[:, :PRED_LEN]     # drop lane padding
    dec = dec.reshape(Bb, Cc, N_PATCH * PRED_LEN)
    return jnp.transpose(dec, (0, 2, 1))        # (B, N_PATCH*pred_len, n_vars)


# ----------------------------- pure-JAX reference ----------------------------
def reference_forward(x_enc, p):
    Bb, Ll, Cc = x_enc.shape
    x = jnp.transpose(x_enc, (0, 2, 1))
    x = x.reshape(Bb, Cc, Ll // MULT, MULT).max(axis=-1)         # MaxPool1d
    x = x.reshape(Bb * Cc, N_PATCH, PATCH)                       # unfold + merge
    pe = sinusoidal_pe(N_PATCH, D_MODEL)
    h = x @ p['w_emb'].T + pe[None]
    scale = 1.0 / math.sqrt(HEAD_DIM)
    causal = jnp.tril(jnp.ones((N_PATCH, N_PATCH), dtype=bool))

    def ln(v, g, b):
        mu = v.mean(-1, keepdims=True)
        var = ((v - mu) ** 2).mean(-1, keepdims=True)
        return (v - mu) * jax.lax.rsqrt(var + EPS) * g + b

    for l in range(E_LAYERS):
        q = h @ p['wq'][l].T + p['bq'][l]
        k = h @ p['wk'][l].T + p['bk'][l]
        v = h @ p['wv'][l].T + p['bv'][l]
        bc = q.shape[0]
        q4 = q.reshape(bc, N_PATCH, N_HEADS, HEAD_DIM)
        k4 = k.reshape(bc, N_PATCH, N_HEADS, HEAD_DIM)
        v4 = v.reshape(bc, N_PATCH, N_HEADS, HEAD_DIM)
        s = jnp.einsum('blhe,bshe->bhls', q4, k4)
        s = jnp.where(causal[None, None], s, -jnp.inf)
        a = jax.nn.softmax(scale * s, axis=-1)
        o = jnp.einsum('bhls,bshd->blhd', a, v4).reshape(bc, N_PATCH, D_MODEL)
        o = o @ p['wo'][l].T + p['bo'][l]
        h = ln(h + o, p['g1'][l], p['be1'][l])
        y = jnp.maximum(h @ p['w1'][l].T + p['b1'][l], 0.0)
        y = y @ p['w2'][l].T + p['b2'][l]
        h = ln(h + y, p['g2'][l], p['be2'][l])
    h = ln(h, p['gf'], p['bef'])
    dec = h @ p['wh'].T + p['bh']
    dec = dec.reshape(Bb, Cc, N_PATCH * PRED_LEN)
    return jnp.transpose(dec, (0, 2, 1))


# ----------------------------- main ------------------------------------------
if __name__ == "__main__":
    key = jax.random.PRNGKey(0)
    k_x, k_p = jax.random.split(key)
    x_enc = jax.random.normal(k_x, (B, L, C), dtype=jnp.float32)
    params = init_params(k_p)

    out = gpht_block_forward(x_enc, params)
    out = jax.block_until_ready(out)
    assert out.shape == (B, N_PATCH * PRED_LEN, C), out.shape

    ref = jax.block_until_ready(reference_forward(x_enc, params))
    err = float(jnp.max(jnp.abs(out - ref)))
    # slightly looser tolerance: softmax denominator uses approx reciprocal (EUP)
    if not np.isfinite(err) or err > 2e-3:
        raise SystemExit(f"mismatch vs reference: max abs err = {err}")
    print("KERNEL_OK")
</pallas_src>

<mosaic_0001>
module attributes {stable_mosaic.version = 11 : i64} {
  func.func @gpht_block_kernel(%arg0: i32, %arg1: memref<1x32x4xf32, #tpu.memory_space<vmem>>, %arg2: memref<50x32xf32, #tpu.memory_space<vmem>>, %arg3: memref<2x33x128xf32, #tpu.memory_space<vmem>>, %arg4: memref<2x96x32xf32, #tpu.memory_space<vmem>>, %arg5: memref<2x33x64xf32, #tpu.memory_space<vmem>>, %arg6: memref<33x128xf32, #tpu.memory_space<vmem>>, %arg7: memref<128x32xf32, #tpu.memory_space<vmem>>, %arg8: memref<128x32xf32, #tpu.memory_space<vmem>>, %arg9: memref<1x32x128xf32, #tpu.memory_space<vmem>>) attributes {dimension_semantics = [#tpu.dimension_semantics<parallel>], iteration_bounds = array<i64: 1>, scalar_prefetch = 0 : i64, scratch_operands = 0 : i64, tpu.core_type = #tpu.core_type<tc>, window_params = [{transform_indices = @transform_0, window_bounds = array<i64: 1, 32, 4>}, {pipeline_mode = #tpu.pipeline_mode<synchronous>, transform_indices = @transform_1, window_bounds = array<i64: 50, 32>}, {pipeline_mode = #tpu.pipeline_mode<synchronous>, transform_indices = @transform_2, window_bounds = array<i64: 2, 33, 128>}, {pipeline_mode = #tpu.pipeline_mode<synchronous>, transform_indices = @transform_3, window_bounds = array<i64: 2, 96, 32>}, {pipeline_mode = #tpu.pipeline_mode<synchronous>, transform_indices = @transform_4, window_bounds = array<i64: 2, 33, 64>}, {pipeline_mode = #tpu.pipeline_mode<synchronous>, transform_indices = @transform_5, window_bounds = array<i64: 33, 128>}, {pipeline_mode = #tpu.pipeline_mode<synchronous>, transform_indices = @transform_6, window_bounds = array<i64: 128, 32>}, {pipeline_mode = #tpu.pipeline_mode<synchronous>, transform_indices = @transform_7, window_bounds = array<i64: 128, 32>}, {transform_indices = @transform_8, window_bounds = array<i64: 1, 32, 128>}]} {
    %c0 = arith.constant 0 : index
    %c0_0 = arith.constant 0 : index
    %0 = vector.load %arg2[%c0, %c0_0] : memref<50x32xf32, #tpu.memory_space<vmem>>, vector<50x32xf32>
    %1 = vector.extract_strided_slice %0 {offsets = [0, 0], sizes = [4, 32], strides = [1, 1]} : vector<50x32xf32> to vector<4x32xf32>
    %2 = vector.extract_strided_slice %0 {offsets = [4, 0], sizes = [32, 32], strides = [1, 1]} : vector<50x32xf32> to vector<32x32xf32>
    %c0_1 = arith.constant 0 : index
    %c0_2 = arith.constant 0 : index
    %3 = vector.load %arg7[%c0_1, %c0_2] : memref<128x32xf32, #tpu.memory_space<vmem>>, vector<128x32xf32>
    %c0_3 = arith.constant 0 : index
    %c0_4 = arith.constant 0 : index
    %4 = vector.load %arg8[%c0_3, %c0_4] : memref<128x32xf32, #tpu.memory_space<vmem>>, vector<128x32xf32>
    %c0_5 = arith.constant 0 : index
    %c0_6 = arith.constant 0 : index
    %c0_7 = arith.constant 0 : index
    %5 = vector.load %arg1[%c0_5, %c0_6, %c0_7] : memref<1x32x4xf32, #tpu.memory_space<vmem>>, vector<1x32x4xf32>
    %6 = vector.shape_cast %5 : vector<1x32x4xf32> to vector<32x4xf32>
    %cst = arith.constant dense<0.000000e+00> : vector<32x32xf32>
    %7 = tpu.matmul %6, %1, %cst {dimension_numbers = #tpu.dot_dimension_numbers<[1], [0], [0], [1], [0, 0, 1, 1], [], []>} : vector<32x4xf32>, vector<4x32xf32>, vector<32x32xf32> -> vector<32x32xf32>
    %8 = arith.addf %7, %2 : vector<32x32xf32>
    %c0_8 = arith.constant 0 : index
    %c0_9 = arith.constant 0 : index
    %c0_10 = arith.constant 0 : index
    %9 = vector.load %arg3[%c0_8, %c0_9, %c0_10] : memref<2x33x128xf32, #tpu.memory_space<vmem>>, vector<1x33x128xf32>
    %10 = vector.shape_cast %9 : vector<1x33x128xf32> to vector<33x128xf32>
    %c0_11 = arith.constant 0 : index
    %c0_12 = arith.constant 0 : index
    %c0_13 = arith.constant 0 : index
    %11 = vector.load %arg4[%c0_11, %c0_12, %c0_13] : memref<2x96x32xf32, #tpu.memory_space<vmem>>, vector<1x96x32xf32>
    %12 = vector.shape_cast %11 : vector<1x96x32xf32> to vector<96x32xf32>
    %c0_14 = arith.constant 0 : index
    %c0_15 = arith.constant 0 : index
    %c0_16 = arith.constant 0 : index
    %13 = vector.load %arg5[%c0_14, %c0_15, %c0_16] : memref<2x33x64xf32, #tpu.memory_space<vmem>>, vector<1x33x64xf32>
    %14 = vector.shape_cast %13 : vector<1x33x64xf32> to vector<33x64xf32>
    %15 = vector.extract_strided_slice %10 {offsets = [0, 0], sizes = [32, 128], strides = [1, 1]} : vector<33x128xf32> to vector<32x128xf32>
    %cst_17 = arith.constant dense<0.000000e+00> : vector<32x128xf32>
    %16 = tpu.matmul %8, %15, %cst_17 {dimension_numbers = #tpu.dot_dimension_numbers<[1], [0], [0], [1], [0, 0, 1, 1], [], []>} : vector<32x32xf32>, vector<32x128xf32>, vector<32x128xf32> -> vector<32x128xf32>
    %17 = vector.extract_strided_slice %10 {offsets = [32, 0], sizes = [1, 128], strides = [1, 1]} : vector<33x128xf32> to vector<1x128xf32>
    %18 = vector.broadcast %17 : vector<1x128xf32> to vector<32x128xf32>
    %19 = arith.addf %16, %18 : vector<32x128xf32>
    %20 = vector.extract_strided_slice %19 {offsets = [0, 0], sizes = [32, 32], strides = [1, 1]} : vector<32x128xf32> to vector<32x32xf32>
    %21 = vector.extract_strided_slice %19 {offsets = [0, 32], sizes = [32, 32], strides = [1, 1]} : vector<32x128xf32> to vector<32x32xf32>
    %22 = vector.extract_strided_slice %19 {offsets = [0, 64], sizes = [32, 32], strides = [1, 1]} : vector<32x128xf32> to vector<32x32xf32>
    %23 = tpu.concatenate %20, %20, %20, %20 in 0 : vector<32x32xf32>, vector<32x32xf32>, vector<32x32xf32>, vector<32x32xf32> -> vector<128x32xf32>
    %24 = arith.mulf %23, %3 : vector<128x32xf32>
    %cst_18 = arith.constant dense<0.000000e+00> : vector<128x32xf32>
    %25 = tpu.matmul %24, %21, %cst_18 {dimension_numbers = #tpu.dot_dimension_numbers<[1], [1], [0], [0], [0, 0, 1, 0], [], []>} : vector<128x32xf32>, vector<32x32xf32>, vector<128x32xf32> -> vector<128x32xf32>
    %cst_19 = arith.constant 0.353553385 : f32
    %26 = vector.broadcast %cst_19 : f32 to vector<128x32xf32>
    %27 = arith.mulf %26, %25 : vector<128x32xf32>
    %28 = arith.addf %27, %4 : vector<128x32xf32>
    %cst_20 = arith.constant dense<0xFF800000> : vector<128xf32>
    %29 = vector.multi_reduction <maximumf>, %28, %cst_20 [1] : vector<128x32xf32> to vector<128xf32>
    %30 = vector.shape_cast %29 : vector<128xf32> to vector<128x1xf32>
    %31 = vector.broadcast %30 : vector<128x1xf32> to vector<128x32xf32>
    %32 = arith.subf %28, %31 : vector<128x32xf32>
    %33 = math.exp %32 : vector<128x32xf32>
    %cst_21 = arith.constant dense<0.000000e+00> : vector<128xf32>
    %34 = vector.multi_reduction <add>, %33, %cst_21 [1] : vector<128x32xf32> to vector<128xf32>
    %35 = vector.shape_cast %34 : vector<128xf32> to vector<128x1xf32>
    %36 = tpu.reciprocal %35 {approx = true} : vector<128x1xf32> -> vector<128x1xf32>
    %37 = vector.broadcast %36 : vector<128x1xf32> to vector<128x32xf32>
    %38 = arith.mulf %33, %37 : vector<128x32xf32>
    %cst_22 = arith.constant dense<0.000000e+00> : vector<128x32xf32>
    %39 = tpu.matmul %38, %22, %cst_22 {dimension_numbers = #tpu.dot_dimension_numbers<[1], [0], [0], [1], [0, 0, 1, 1], [], []>} : vector<128x32xf32>, vector<32x32xf32>, vector<128x32xf32> -> vector<128x32xf32>
    %40 = arith.mulf %39, %3 : vector<128x32xf32>
    %41 = vector.extract_strided_slice %40 {offsets = [0, 0], sizes = [32, 32], strides = [1, 1]} : vector<128x32xf32> to vector<32x32xf32>
    %42 = vector.extract_strided_slice %40 {offsets = [32, 0], sizes = [32, 32], strides = [1, 1]} : vector<128x32xf32> to vector<32x32xf32>
    %43 = arith.addf %41, %42 : vector<32x32xf32>
    %44 = vector.extract_strided_slice %40 {offsets = [64, 0], sizes = [32, 32], strides = [1, 1]} : vector<128x32xf32> to vector<32x32xf32>
    %45 = arith.addf %43, %44 : vector<32x32xf32>
    %46 = vector.extract_strided_slice %40 {offsets = [96, 0], sizes = [32, 32], strides = [1, 1]} : vector<128x32xf32> to vector<32x32xf32>
    %47 = arith.addf %45, %46 : vector<32x32xf32>
    %48 = vector.extract_strided_slice %12 {offsets = [0, 0], sizes = [32, 32], strides = [1, 1]} : vector<96x32xf32> to vector<32x32xf32>
    %cst_23 = arith.constant dense<0.000000e+00> : vector<32x32xf32>
    %49 = tpu.matmul %47, %48, %cst_23 {dimension_numbers = #tpu.dot_dimension_numbers<[1], [0], [0], [1], [0, 0, 1, 1], [], []>} : vector<32x32xf32>, vector<32x32xf32>, vector<32x32xf32> -> vector<32x32xf32>
    %50 = vector.extract_strided_slice %0 {offsets = [36, 0], sizes = [1, 32], strides = [1, 1]} : vector<50x32xf32> to vector<1x32xf32>
    %51 = vector.broadcast %50 : vector<1x32xf32> to vector<32x32xf32>
    %52 = arith.addf %49, %51 : vector<32x32xf32>
    %53 = arith.addf %8, %52 : vector<32x32xf32>
    %54 = vector.extract_strided_slice %0 {offsets = [38, 0], sizes = [1, 32], strides = [1, 1]} : vector<50x32xf32> to vector<1x32xf32>
    %55 = vector.extract_strided_slice %0 {offsets = [39, 0], sizes = [1, 32], strides = [1, 1]} : vector<50x32xf32> to vector<1x32xf32>
    %cst_24 = arith.constant dense<0.000000e+00> : vector<32xf32>
    %56 = vector.multi_reduction <add>, %53, %cst_24 [1] : vector<32x32xf32> to vector<32xf32>
    %57 = vector.shape_cast %56 : vector<32xf32> to vector<32x1xf32>
    %cst_25 = arith.constant 3.200000e+01 : f32
    %58 = vector.broadcast %cst_25 : f32 to vector<32x1xf32>
    %59 = arith.divf %57, %58 : vector<32x1xf32>
    %60 = vector.broadcast %59 : vector<32x1xf32> to vector<32x32xf32>
    %61 = arith.subf %53, %60 : vector<32x32xf32>
    %62 = arith.mulf %61, %61 : vector<32x32xf32>
    %cst_26 = arith.constant dense<0.000000e+00> : vector<32xf32>
    %63 = vector.multi_reduction <add>, %62, %cst_26 [1] : vector<32x32xf32> to vector<32xf32>
    %64 = vector.shape_cast %63 : vector<32xf32> to vector<32x1xf32>
    %cst_27 = arith.constant 3.200000e+01 : f32
    %65 = vector.broadcast %cst_27 : f32 to vector<32x1xf32>
    %66 = arith.divf %64, %65 : vector<32x1xf32>
    %67 = vector.broadcast %59 : vector<32x1xf32> to vector<32x32xf32>
    %68 = arith.subf %53, %67 : vector<32x32xf32>
    %cst_28 = arith.constant 9.99999974E-6 : f32
    %69 = vector.broadcast %cst_28 : f32 to vector<32x1xf32>
    %70 = arith.addf %66, %69 : vector<32x1xf32>
    %71 = math.rsqrt %70 : vector<32x1xf32>
    %72 = vector.broadcast %71 : vector<32x1xf32> to vector<32x32xf32>
    %73 = arith.mulf %68, %72 : vector<32x32xf32>
    %74 = vector.broadcast %54 : vector<1x32xf32> to vector<32x32xf32>
    %75 = arith.mulf %73, %74 : vector<32x32xf32>
    %76 = vector.broadcast %55 : vector<1x32xf32> to vector<32x32xf32>
    %77 = arith.addf %75, %76 : vector<32x32xf32>
    %78 = vector.extract_strided_slice %14 {offsets = [0, 0], sizes = [32, 64], strides = [1, 1]} : vector<33x64xf32> to vector<32x64xf32>
    %cst_29 = arith.constant dense<0.000000e+00> : vector<32x64xf32>
    %79 = tpu.matmul %77, %78, %cst_29 {dimension_numbers = #tpu.dot_dimension_numbers<[1], [0], [0], [1], [0, 0, 1, 1], [], []>} : vector<32x32xf32>, vector<32x64xf32>, vector<32x64xf32> -> vector<32x64xf32>
    %80 = vector.extract_strided_slice %14 {offsets = [32, 0], sizes = [1, 64], strides = [1, 1]} : vector<33x64xf32> to vector<1x64xf32>
    %81 = vector.broadcast %80 : vector<1x64xf32> to vector<32x64xf32>
    %82 = arith.addf %79, %81 : vector<32x64xf32>
    %cst_30 = arith.constant 0.000000e+00 : f32
    %83 = vector.broadcast %cst_30 : f32 to vector<32x64xf32>
    %84 = arith.maximumf %82, %83 : vector<32x64xf32>
    %85 = vector.extract_strided_slice %12 {offsets = [32, 0], sizes = [64, 32], strides = [1, 1]} : vector<96x32xf32> to vector<64x32xf32>
    %cst_31 = arith.constant dense<0.000000e+00> : vector<32x32xf32>
    %86 = tpu.matmul %84, %85, %cst_31 {dimension_numbers = #tpu.dot_dimension_numbers<[1], [0], [0], [1], [0, 0, 1, 1], [], []>} : vector<32x64xf32>, vector<64x32xf32>, vector<32x32xf32> -> vector<32x32xf32>
    %87 = vector.extract_strided_slice %0 {offsets = [37, 0], sizes = [1, 32], strides = [1, 1]} : vector<50x32xf32> to vector<1x32xf32>
    %88 = vector.broadcast %87 : vector<1x32xf32> to vector<32x32xf32>
    %89 = arith.addf %86, %88 : vector<32x32xf32>
    %90 = arith.addf %77, %89 : vector<32x32xf32>
    %91 = vector.extract_strided_slice %0 {offsets = [40, 0], sizes = [1, 32], strides = [1, 1]} : vector<50x32xf32> to vector<1x32xf32>
    %92 = vector.extract_strided_slice %0 {offsets = [41, 0], sizes = [1, 32], strides = [1, 1]} : vector<50x32xf32> to vector<1x32xf32>
    %cst_32 = arith.constant dense<0.000000e+00> : vector<32xf32>
    %93 = vector.multi_reduction <add>, %90, %cst_32 [1] : vector<32x32xf32> to vector<32xf32>
    %94 = vector.shape_cast %93 : vector<32xf32> to vector<32x1xf32>
    %cst_33 = arith.constant 3.200000e+01 : f32
    %95 = vector.broadcast %cst_33 : f32 to vector<32x1xf32>
    %96 = arith.divf %94, %95 : vector<32x1xf32>
    %97 = vector.broadcast %96 : vector<32x1xf32> to vector<32x32xf32>
    %98 = arith.subf %90, %97 : vector<32x32xf32>
    %99 = arith.mulf %98, %98 : vector<32x32xf32>
    %cst_34 = arith.constant dense<0.000000e+00> : vector<32xf32>
    %100 = vector.multi_reduction <add>, %99, %cst_34 [1] : vector<32x32xf32> to vector<32xf32>
    %101 = vector.shape_cast %100 : vector<32xf32> to vector<32x1xf32>
    %cst_35 = arith.constant 3.200000e+01 : f32
    %102 = vector.broadcast %cst_35 : f32 to vector<32x1xf32>
    %103 = arith.divf %101, %102 : vector<32x1xf32>
    %104 = vector.broadcast %96 : vector<32x1xf32> to vector<32x32xf32>
    %105 = arith.subf %90, %104 : vector<32x32xf32>
    %cst_36 = arith.constant 9.99999974E-6 : f32
    %106 = vector.broadcast %cst_36 : f32 to vector<32x1xf32>
    %107 = arith.addf %103, %106 : vector<32x1xf32>
    %108 = math.rsqrt %107 : vector<32x1xf32>
    %109 = vector.broadcast %108 : vector<32x1xf32> to vector<32x32xf32>
    %110 = arith.mulf %105, %109 : vector<32x32xf32>
    %111 = vector.broadcast %91 : vector<1x32xf32> to vector<32x32xf32>
    %112 = arith.mulf %110, %111 : vector<32x32xf32>
    %113 = vector.broadcast %92 : vector<1x32xf32> to vector<32x32xf32>
    %114 = arith.addf %112, %113 : vector<32x32xf32>
    %c1 = arith.constant 1 : index
    %c0_37 = arith.constant 0 : index
    %c0_38 = arith.constant 0 : index
    %115 = vector.load %arg3[%c1, %c0_37, %c0_38] : memref<2x33x128xf32, #tpu.memory_space<vmem>>, vector<1x33x128xf32>
    %116 = vector.shape_cast %115 : vector<1x33x128xf32> to vector<33x128xf32>
    %c1_39 = arith.constant 1 : index
    %c0_40 = arith.constant 0 : index
    %c0_41 = arith.constant 0 : index
    %117 = vector.load %arg4[%c1_39, %c0_40, %c0_41] : memref<2x96x32xf32, #tpu.memory_space<vmem>>, vector<1x96x32xf32>
    %118 = vector.shape_cast %117 : vector<1x96x32xf32> to vector<96x32xf32>
    %c1_42 = arith.constant 1 : index
    %c0_43 = arith.constant 0 : index
    %c0_44 = arith.constant 0 : index
    %119 = vector.load %arg5[%c1_42, %c0_43, %c0_44] : memref<2x33x64xf32, #tpu.memory_space<vmem>>, vector<1x33x64xf32>
    %120 = vector.shape_cast %119 : vector<1x33x64xf32> to vector<33x64xf32>
    %121 = vector.extract_strided_slice %116 {offsets = [0, 0], sizes = [32, 128], strides = [1, 1]} : vector<33x128xf32> to vector<32x128xf32>
    %cst_45 = arith.constant dense<0.000000e+00> : vector<32x128xf32>
    %122 = tpu.matmul %114, %121, %cst_45 {dimension_numbers = #tpu.dot_dimension_numbers<[1], [0], [0], [1], [0, 0, 1, 1], [], []>} : vector<32x32xf32>, vector<32x128xf32>, vector<32x128xf32> -> vector<32x128xf32>
    %123 = vector.extract_strided_slice %116 {offsets = [32, 0], sizes = [1, 128], strides = [1, 1]} : vector<33x128xf32> to vector<1x128xf32>
    %124 = vector.broadcast %123 : vector<1x128xf32> to vector<32x128xf32>
    %125 = arith.addf %122, %124 : vector<32x128xf32>
    %126 = vector.extract_strided_slice %125 {offsets = [0, 0], sizes = [32, 32], strides = [1, 1]} : vector<32x128xf32> to vector<32x32xf32>
    %127 = vector.extract_strided_slice %125 {offsets = [0, 32], sizes = [32, 32], strides = [1, 1]} : vector<32x128xf32> to vector<32x32xf32>
    %128 = vector.extract_strided_slice %125 {offsets = [0, 64], sizes = [32, 32], strides = [1, 1]} : vector<32x128xf32> to vector<32x32xf32>
    %129 = tpu.concatenate %126, %126, %126, %126 in 0 : vector<32x32xf32>, vector<32x32xf32>, vector<32x32xf32>, vector<32x32xf32> -> vector<128x32xf32>
    %130 = arith.mulf %129, %3 : vector<128x32xf32>
    %cst_46 = arith.constant dense<0.000000e+00> : vector<128x32xf32>
    %131 = tpu.matmul %130, %127, %cst_46 {dimension_numbers = #tpu.dot_dimension_numbers<[1], [1], [0], [0], [0, 0, 1, 0], [], []>} : vector<128x32xf32>, vector<32x32xf32>, vector<128x32xf32> -> vector<128x32xf32>
    %cst_47 = arith.constant 0.353553385 : f32
    %132 = vector.broadcast %cst_47 : f32 to vector<128x32xf32>
    %133 = arith.mulf %132, %131 : vector<128x32xf32>
    %134 = arith.addf %133, %4 : vector<128x32xf32>
    %cst_48 = arith.constant dense<0xFF800000> : vector<128xf32>
    %135 = vector.multi_reduction <maximumf>, %134, %cst_48 [1] : vector<128x32xf32> to vector<128xf32>
    %136 = vector.shape_cast %135 : vector<128xf32> to vector<128x1xf32>
    %137 = vector.broadcast %136 : vector<128x1xf32> to vector<128x32xf32>
    %138 = arith.subf %134, %137 : vector<128x32xf32>
    %139 = math.exp %138 : vector<128x32xf32>
    %cst_49 = arith.constant dense<0.000000e+00> : vector<128xf32>
    %140 = vector.multi_reduction <add>, %139, %cst_49 [1] : vector<128x32xf32> to vector<128xf32>
    %141 = vector.shape_cast %140 : vector<128xf32> to vector<128x1xf32>
    %142 = tpu.reciprocal %141 {approx = true} : vector<128x1xf32> -> vector<128x1xf32>
    %143 = vector.broadcast %142 : vector<128x1xf32> to vector<128x32xf32>
    %144 = arith.mulf %139, %143 : vector<128x32xf32>
    %cst_50 = arith.constant dense<0.000000e+00> : vector<128x32xf32>
    %145 = tpu.matmul %144, %128, %cst_50 {dimension_numbers = #tpu.dot_dimension_numbers<[1], [0], [0], [1], [0, 0, 1, 1], [], []>} : vector<128x32xf32>, vector<32x32xf32>, vector<128x32xf32> -> vector<128x32xf32>
    %146 = arith.mulf %145, %3 : vector<128x32xf32>
    %147 = vector.extract_strided_slice %146 {offsets = [0, 0], sizes = [32, 32], strides = [1, 1]} : vector<128x32xf32> to vector<32x32xf32>
    %148 = vector.extract_strided_slice %146 {offsets = [32, 0], sizes = [32, 32], strides = [1, 1]} : vector<128x32xf32> to vector<32x32xf32>
    %149 = arith.addf %147, %148 : vector<32x32xf32>
    %150 = vector.extract_strided_slice %146 {offsets = [64, 0], sizes = [32, 32], strides = [1, 1]} : vector<128x32xf32> to vector<32x32xf32>
    %151 = arith.addf %149, %150 : vector<32x32xf32>
    %152 = vector.extract_strided_slice %146 {offsets = [96, 0], sizes = [32, 32], strides = [1, 1]} : vector<128x32xf32> to vector<32x32xf32>
    %153 = arith.addf %151, %152 : vector<32x32xf32>
    %154 = vector.extract_strided_slice %118 {offsets = [0, 0], sizes = [32, 32], strides = [1, 1]} : vector<96x32xf32> to vector<32x32xf32>
    %cst_51 = arith.constant dense<0.000000e+00> : vector<32x32xf32>
    %155 = tpu.matmul %153, %154, %cst_51 {dimension_numbers = #tpu.dot_dimension_numbers<[1], [0], [0], [1], [0, 0, 1, 1], [], []>} : vector<32x32xf32>, vector<32x32xf32>, vector<32x32xf32> -> vector<32x32xf32>
    %156 = vector.extract_strided_slice %0 {offsets = [42, 0], sizes = [1, 32], strides = [1, 1]} : vector<50x32xf32> to vector<1x32xf32>
    %157 = vector.broadcast %156 : vector<1x32xf32> to vector<32x32xf32>
    %158 = arith.addf %155, %157 : vector<32x32xf32>
    %159 = arith.addf %114, %158 : vector<32x32xf32>
    %160 = vector.extract_strided_slice %0 {offsets = [44, 0], sizes = [1, 32], strides = [1, 1]} : vector<50x32xf32> to vector<1x32xf32>
    %161 = vector.extract_strided_slice %0 {offsets = [45, 0], sizes = [1, 32], strides = [1, 1]} : vector<50x32xf32> to vector<1x32xf32>
    %cst_52 = arith.constant dense<0.000000e+00> : vector<32xf32>
    %162 = vector.multi_reduction <add>, %159, %cst_52 [1] : vector<32x32xf32> to vector<32xf32>
    %163 = vector.shape_cast %162 : vector<32xf32> to vector<32x1xf32>
    %cst_53 = arith.constant 3.200000e+01 : f32
    %164 = vector.broadcast %cst_53 : f32 to vector<32x1xf32>
    %165 = arith.divf %163, %164 : vector<32x1xf32>
    %166 = vector.broadcast %165 : vector<32x1xf32> to vector<32x32xf32>
    %167 = arith.subf %159, %166 : vector<32x32xf32>
    %168 = arith.mulf %167, %167 : vector<32x32xf32>
    %cst_54 = arith.constant dense<0.000000e+00> : vector<32xf32>
    %169 = vector.multi_reduction <add>, %168, %cst_54 [1] : vector<32x32xf32> to vector<32xf32>
    %170 = vector.shape_cast %169 : vector<32xf32> to vector<32x1xf32>
    %cst_55 = arith.constant 3.200000e+01 : f32
    %171 = vector.broadcast %cst_55 : f32 to vector<32x1xf32>
    %172 = arith.divf %170, %171 : vector<32x1xf32>
    %173 = vector.broadcast %165 : vector<32x1xf32> to vector<32x32xf32>
    %174 = arith.subf %159, %173 : vector<32x32xf32>
    %cst_56 = arith.constant 9.99999974E-6 : f32
    %175 = vector.broadcast %cst_56 : f32 to vector<32x1xf32>
    %176 = arith.addf %172, %175 : vector<32x1xf32>
    %177 = math.rsqrt %176 : vector<32x1xf32>
    %178 = vector.broadcast %177 : vector<32x1xf32> to vector<32x32xf32>
    %179 = arith.mulf %174, %178 : vector<32x32xf32>
    %180 = vector.broadcast %160 : vector<1x32xf32> to vector<32x32xf32>
    %181 = arith.mulf %179, %180 : vector<32x32xf32>
    %182 = vector.broadcast %161 : vector<1x32xf32> to vector<32x32xf32>
    %183 = arith.addf %181, %182 : vector<32x32xf32>
    %184 = vector.extract_strided_slice %120 {offsets = [0, 0], sizes = [32, 64], strides = [1, 1]} : vector<33x64xf32> to vector<32x64xf32>
    %cst_57 = arith.constant dense<0.000000e+00> : vector<32x64xf32>
    %185 = tpu.matmul %183, %184, %cst_57 {dimension_numbers = #tpu.dot_dimension_numbers<[1], [0], [0], [1], [0, 0, 1, 1], [], []>} : vector<32x32xf32>, vector<32x64xf32>, vector<32x64xf32> -> vector<32x64xf32>
    %186 = vector.extract_strided_slice %120 {offsets = [32, 0], sizes = [1, 64], strides = [1, 1]} : vector<33x64xf32> to vector<1x64xf32>
    %187 = vector.broadcast %186 : vector<1x64xf32> to vector<32x64xf32>
    %188 = arith.addf %185, %187 : vector<32x64xf32>
    %cst_58 = arith.constant 0.000000e+00 : f32
    %189 = vector.broadcast %cst_58 : f32 to vector<32x64xf32>
    %190 = arith.maximumf %188, %189 : vector<32x64xf32>
    %191 = vector.extract_strided_slice %118 {offsets = [32, 0], sizes = [64, 32], strides = [1, 1]} : vector<96x32xf32> to vector<64x32xf32>
    %cst_59 = arith.constant dense<0.000000e+00> : vector<32x32xf32>
    %192 = tpu.matmul %190, %191, %cst_59 {dimension_numbers = #tpu.dot_dimension_numbers<[1], [0], [0], [1], [0, 0, 1, 1], [], []>} : vector<32x64xf32>, vector<64x32xf32>, vector<32x32xf32> -> vector<32x32xf32>
    %193 = vector.extract_strided_slice %0 {offsets = [43, 0], sizes = [1, 32], strides = [1, 1]} : vector<50x32xf32> to vector<1x32xf32>
    %194 = vector.broadcast %193 : vector<1x32xf32> to vector<32x32xf32>
    %195 = arith.addf %192, %194 : vector<32x32xf32>
    %196 = arith.addf %183, %195 : vector<32x32xf32>
    %197 = vector.extract_strided_slice %0 {offsets = [46, 0], sizes = [1, 32], strides = [1, 1]} : vector<50x32xf32> to vector<1x32xf32>
    %198 = vector.extract_strided_slice %0 {offsets = [47, 0], sizes = [1, 32], strides = [1, 1]} : vector<50x32xf32> to vector<1x32xf32>
    %cst_60 = arith.constant dense<0.000000e+00> : vector<32xf32>
    %199 = vector.multi_reduction <add>, %196, %cst_60 [1] : vector<32x32xf32> to vector<32xf32>
    %200 = vector.shape_cast %199 : vector<32xf32> to vector<32x1xf32>
    %cst_61 = arith.constant 3.200000e+01 : f32
    %201 = vector.broadcast %cst_61 : f32 to vector<32x1xf32>
    %202 = arith.divf %200, %201 : vector<32x1xf32>
    %203 = vector.broadcast %202 : vector<32x1xf32> to vector<32x32xf32>
    %204 = arith.subf %196, %203 : vector<32x32xf32>
    %205 = arith.mulf %204, %204 : vector<32x32xf32>
    %cst_62 = arith.constant dense<0.000000e+00> : vector<32xf32>
    %206 = vector.multi_reduction <add>, %205, %cst_62 [1] : vector<32x32xf32> to vector<32xf32>
    %207 = vector.shape_cast %206 : vector<32xf32> to vector<32x1xf32>
    %cst_63 = arith.constant 3.200000e+01 : f32
    %208 = vector.broadcast %cst_63 : f32 to vector<32x1xf32>
    %209 = arith.divf %207, %208 : vector<32x1xf32>
    %210 = vector.broadcast %202 : vector<32x1xf32> to vector<32x32xf32>
    %211 = arith.subf %196, %210 : vector<32x32xf32>
    %cst_64 = arith.constant 9.99999974E-6 : f32
    %212 = vector.broadcast %cst_64 : f32 to vector<32x1xf32>
    %213 = arith.addf %209, %212 : vector<32x1xf32>
    %214 = math.rsqrt %213 : vector<32x1xf32>
    %215 = vector.broadcast %214 : vector<32x1xf32> to vector<32x32xf32>
    %216 = arith.mulf %211, %215 : vector<32x32xf32>
    %217 = vector.broadcast %197 : vector<1x32xf32> to vector<32x32xf32>
    %218 = arith.mulf %216, %217 : vector<32x32xf32>
    %219 = vector.broadcast %198 : vector<1x32xf32> to vector<32x32xf32>
    %220 = arith.addf %218, %219 : vector<32x32xf32>
    %221 = vector.extract_strided_slice %0 {offsets = [48, 0], sizes = [1, 32], strides = [1, 1]} : vector<50x32xf32> to vector<1x32xf32>
    %222 = vector.extract_strided_slice %0 {offsets = [49, 0], sizes = [1, 32], strides = [1, 1]} : vector<50x32xf32> to vector<1x32xf32>
    %cst_65 = arith.constant dense<0.000000e+00> : vector<32xf32>
    %223 = vector.multi_reduction <add>, %220, %cst_65 [1] : vector<32x32xf32> to vector<32xf32>
    %224 = vector.shape_cast %223 : vector<32xf32> to vector<32x1xf32>
    %cst_66 = arith.constant 3.200000e+01 : f32
    %225 = vector.broadcast %cst_66 : f32 to vector<32x1xf32>
    %226 = arith.divf %224, %225 : vector<32x1xf32>
    %227 = vector.broadcast %226 : vector<32x1xf32> to vector<32x32xf32>
    %228 = arith.subf %220, %227 : vector<32x32xf32>
    %229 = arith.mulf %228, %228 : vector<32x32xf32>
    %cst_67 = arith.constant dense<0.000000e+00> : vector<32xf32>
    %230 = vector.multi_reduction <add>, %229, %cst_67 [1] : vector<32x32xf32> to vector<32xf32>
    %231 = vector.shape_cast %230 : vector<32xf32> to vector<32x1xf32>
    %cst_68 = arith.constant 3.200000e+01 : f32
    %232 = vector.broadcast %cst_68 : f32 to vector<32x1xf32>
    %233 = arith.divf %231, %232 : vector<32x1xf32>
    %234 = vector.broadcast %226 : vector<32x1xf32> to vector<32x32xf32>
    %235 = arith.subf %220, %234 : vector<32x32xf32>
    %cst_69 = arith.constant 9.99999974E-6 : f32
    %236 = vector.broadcast %cst_69 : f32 to vector<32x1xf32>
    %237 = arith.addf %233, %236 : vector<32x1xf32>
    %238 = math.rsqrt %237 : vector<32x1xf32>
    %239 = vector.broadcast %238 : vector<32x1xf32> to vector<32x32xf32>
    %240 = arith.mulf %235, %239 : vector<32x32xf32>
    %241 = vector.broadcast %221 : vector<1x32xf32> to vector<32x32xf32>
    %242 = arith.mulf %240, %241 : vector<32x32xf32>
    %243 = vector.broadcast %222 : vector<1x32xf32> to vector<32x32xf32>
    %244 = arith.addf %242, %243 : vector<32x32xf32>
    %c0_70 = arith.constant 0 : index
    %c0_71 = arith.constant 0 : index
    %245 = vector.load %arg6[%c0_70, %c0_71] : memref<33x128xf32, #tpu.memory_space<vmem>>, vector<33x128xf32>
    %246 = vector.extract_strided_slice %245 {offsets = [0, 0], sizes = [32, 128], strides = [1, 1]} : vector<33x128xf32> to vector<32x128xf32>
    %cst_72 = arith.constant dense<0.000000e+00> : vector<32x128xf32>
    %247 = tpu.matmul %244, %246, %cst_72 {dimension_numbers = #tpu.dot_dimension_numbers<[1], [0], [0], [1], [0, 0, 1, 1], [], []>} : vector<32x32xf32>, vector<32x128xf32>, vector<32x128xf32> -> vector<32x128xf32>
    %248 = vector.extract_strided_slice %245 {offsets = [32, 0], sizes = [1, 128], strides = [1, 1]} : vector<33x128xf32> to vector<1x128xf32>
    %249 = vector.broadcast %248 : vector<1x128xf32> to vector<32x128xf32>
    %250 = arith.addf %247, %249 : vector<32x128xf32>
    %c0_73 = arith.constant 0 : index
    %c0_74 = arith.constant 0 : index
    %c0_75 = arith.constant 0 : index
    %251 = vector.load %arg9[%c0_73, %c0_74, %c0_75] : memref<1x32x128xf32, #tpu.memory_space<vmem>>, vector<1x32x128xf32>
    %252 = vector.shape_cast %251 : vector<1x32x128xf32> to vector<32x128xf32>
    %253 = vector.shape_cast %250 : vector<32x128xf32> to vector<1x32x128xf32>
    tpu.vector_store %arg9[%c0_73, %c0_74, %c0_75], %253 {strides = array<i32>} : memref<1x32x128xf32, #tpu.memory_space<vmem>>, vector<1x32x128xf32>,
    return
  }
  func.func @transform_0(%arg0: i32) -> (i32, i32, i32) {
    %c0_i32 = arith.constant 0 : i32
    %c0_i32_0 = arith.constant 0 : i32
    %c0_i32_1 = arith.constant 0 : i32
    return %arg0, %c0_i32, %c0_i32_0 : i32, i32, i32
  }
  func.func @transform_1(%arg0: i32) -> (i32, i32) {
    %c0_i32 = arith.constant 0 : i32
    %c0_i32_0 = arith.constant 0 : i32
    %c0_i32_1 = arith.constant 0 : i32
    return %c0_i32, %c0_i32_0 : i32, i32
  }
  func.func @transform_2(%arg0: i32) -> (i32, i32, i32) {
    %c0_i32 = arith.constant 0 : i32
    %c0_i32_0 = arith.constant 0 : i32
    %c0_i32_1 = arith.constant 0 : i32
    %c0_i32_2 = arith.constant 0 : i32
    return %c0_i32, %c0_i32_0, %c0_i32_1 : i32, i32, i32
  }
  func.func @transform_3(%arg0: i32) -> (i32, i32, i32) {
    %c0_i32 = arith.constant 0 : i32
    %c0_i32_0 = arith.constant 0 : i32
    %c0_i32_1 = arith.constant 0 : i32
    %c0_i32_2 = arith.constant 0 : i32
    return %c0_i32, %c0_i32_0, %c0_i32_1 : i32, i32, i32
  }
  func.func @transform_4(%arg0: i32) -> (i32, i32, i32) {
    %c0_i32 = arith.constant 0 : i32
    %c0_i32_0 = arith.constant 0 : i32
    %c0_i32_1 = arith.constant 0 : i32
    %c0_i32_2 = arith.constant 0 : i32
    return %c0_i32, %c0_i32_0, %c0_i32_1 : i32, i32, i32
  }
  func.func @transform_5(%arg0: i32) -> (i32, i32) {
    %c0_i32 = arith.constant 0 : i32
    %c0_i32_0 = arith.constant 0 : i32
    %c0_i32_1 = arith.constant 0 : i32
    return %c0_i32, %c0_i32_0 : i32, i32
  }
  func.func @transform_6(%arg0: i32) -> (i32, i32) {
    %c0_i32 = arith.constant 0 : i32
    %c0_i32_0 = arith.constant 0 : i32
    %c0_i32_1 = arith.constant 0 : i32
    return %c0_i32, %c0_i32_0 : i32, i32
  }
  func.func @transform_7(%arg0: i32) -> (i32, i32) {
    %c0_i32 = arith.constant 0 : i32
    %c0_i32_0 = arith.constant 0 : i32
    %c0_i32_1 = arith.constant 0 : i32
    return %c0_i32, %c0_i32_0 : i32, i32
  }
  func.func @transform_8(%arg0: i32) -> (i32, i32, i32) {
    %c0_i32 = arith.constant 0 : i32
    %c0_i32_0 = arith.constant 0 : i32
    %c0_i32_1 = arith.constant 0 : i32
    return %arg0, %c0_i32, %c0_i32_0 : i32, i32, i32
  }
}

</mosaic_0001>

<bundles_post_ra>
// kernel: gpht_block_forward.1
= control target key start
LH: loop header
LB: loop body
LE: loop exit
PB: predicated region body
PF: predicated region fallthrough
CT: control target
= control target key end

     0   :  { %vm77_vm0 = vcmask 1043456   ;;  %vm91_vm1 = vcmask 31744   ;;  %vm217_vm2 = vcmask 261120   ;;  %s3654_s12 = smov 96   ;;  %s3655_s30 = smov 64   ;;  %vm1268_vm3 = vcmask 523264   ;;  %s4873_s1 = inlined_call_operand.vmem [shape: f32[50,32], index: 1, kind: input, shape index: {}]   ;;  %s4874_s0 = inlined_call_operand.vmem [shape: f32[1,32,4], index: 0, kind: input, shape index: {}]   ;;  %s4875_s2 = inlined_call_operand.vmem [shape: f32[2,33,128], index: 2, kind: input, shape index: {}]   ;;  %s4876_s6 = inlined_call_operand.vmem [shape: f32[128,32], index: 6, kind: input, shape index: {}]   ;;  %s4877_s7 = inlined_call_operand.vmem [shape: f32[128,32], index: 7, kind: input, shape index: {}]   ;;  %s4878_s3 = inlined_call_operand.vmem [shape: f32[2,96,32], index: 3, kind: input, shape index: {}]   ;;  %s4879_s4 = inlined_call_operand.vmem [shape: f32[2,33,64], index: 4, kind: input, shape index: {}]   ;;  %s4880_s5 = inlined_call_operand.vmem [shape: f32[33,128], index: 5, kind: input, shape index: {}]   ;;  %s4881_s8 = inlined_call_operand.vmem [shape: f32[1,32,128], index: 8, kind: output, shape index: {}]  }
   0x1   :  { %v29_v0 = vld [vmem:[%s4873_s1] sm:$0xff]  ;;  %v69_v2 = vld [vmem:[%s4874_s0 + $0x8] sm:$0xff]  ;;  %v70_v3 = vld [vmem:[%s4874_s0 + $0x10] sm:$0xff] }
   0x2   :  { %v68_v1 = vld [vmem:[%s4874_s0] sm:$0xff]  ;;  %3172 = vmatprep.subr.msk.mxu0 %vm77_vm0, %v29_v0  ;;  %v194_v4 = vld [vmem:[%s4875_s2 + $0x18] sm:$0xff]  ;;  %v193_v6 = vld [vmem:[%s4875_s2 + $0x10] sm:$0xff]  ;;  %v78_v11 = vrot.slane %v29_v0, 4 }
   0x3   :  { %3174 = vmatprep.mubr.msk.f32.mxu0 %vm91_vm1, %v68_v1  ;;  %3173 = vmatpush3.msk.msra.mxu0 %vm77_vm0, %v29_v0  ;;  %v71_v5 = vld [vmem:[%s4874_s0 + $0x18] sm:$0xff]  ;;  %v192_v7 = vld [vmem:[%s4875_s2 + $0x8] sm:$0xff]  ;;  %v191_v8 = vld [vmem:[%s4875_s2] sm:$0xff] }
   0x4   :  { %3175 = vmatmul.mubr.msk.f32.vlgmr.msra.gmra.mxu0 %vm91_vm1, %v69_v2  ;;  %3180 = vmatprep.subr.mxu1 %v194_v4  ;;  %v30_v9 = vld [vmem:[%s4873_s1 + $0x8] sm:$0xff]  ;;  %v31_v10 = vld [vmem:[%s4873_s1 + $0x10] sm:$0xff]  ;;  %v32_v14 = vld [vmem:[%s4873_s1 + $0x18] sm:$0xff] }
   0x5   :  { %3177 = vmatprep.mubr.msk.f32.mxu0 %vm91_vm1, %v70_v3  ;;  %3181 = vmatpush3.msra.mxu1 %v194_v4  ;;  %v79_v12 = vrot.slane %v30_v9, 4  ;;  %v81_v13 = vrot.slane %v31_v10, 4  ;;  %v3742_v15 = vld [vmem:[%s4873_s1 + $0x20] sm:$0xff]  ;;  %v83_v19 = vrot.slane %v32_v14, 4  ;;  %v3802_v45 = vld [vmem:[%s4876_s6 + $0x8] sm:$0xff]  ;;  %v3807_v46 = vld [vmem:[%s4876_s6 + $0x10] sm:$0xff] }
   0x6   :  { %3182 = vmatprep.subr.mxu1 %v193_v6  ;;  %v85_v20 = vrot.slane %v3742_v15, 4  ;;  %v2872_v30 = vld [vmem:[%s4875_s2 + $0x20] ss:$0 sm:$0xff]  ;;  %v3817_v49 = vld [vmem:[%s4876_s6 + $0x18] sm:$0xff]  ;;  %v3833_v53 = vld [vmem:[%s4876_s6 + $0x28] sm:$0xff] }
   0x7   :  { %3183 = vmatpush3.msra.mxu1 %v193_v6  ;;  %v80_v17 = vsel %vm77_vm0, %v78_v11, %v79_v12  ;;  %v82_v18 = vsel %vm77_vm0, %v79_v12, %v81_v13  ;;  %v84_v25 = vsel %vm77_vm0, %v81_v13, %v83_v19  ;;  %v3773_v34 = vld [vmem:[%s4876_s6] sm:$0xff]  ;;  %v3839_v54 = vld [vmem:[%s4876_s6 + $0x30] sm:$0xff]  ;;  %v3849_v57 = vld [vmem:[%s4876_s6 + $0x38] sm:$0xff] }
   0x8   :  { %3178 = vmatmul.mubr.msk.f32.gmra.mxu0 %vm91_vm1, %v71_v5  ;;  %3184 = vmatprep.subr.mxu1 %v192_v7  ;;  %v86_v26 = vsel %vm77_vm0, %v83_v19, %v85_v20  ;;  %v3823_v50 = vld [vmem:[%s4876_s6 + $0x20] sm:$0xff]  ;;  %v3865_v61 = vld [vmem:[%s4876_s6 + $0x48] sm:$0xff]  ;;  %v3871_v62 = vld [vmem:[%s4876_s6 + $0x50] sm:$0xff] }
   0x9   :  { %3185 = vmatpush3.msra.mxu1 %v192_v7  ;;  %v3855_v58 = vld [vmem:[%s4876_s6 + $0x40] sm:$0xff]  ;;  %v3881_v1 = vld [vmem:[%s4876_s6 + $0x58] sm:$0xff]  ;;  %v3897_v5 = vld [vmem:[%s4876_s6 + $0x68] sm:$0xff] }
   0xa   :  { %3186 = vmatprep.subr.mxu1 %v191_v8  ;;  %v3887_v2 = vld [vmem:[%s4876_s6 + $0x60] sm:$0xff]  ;;  %v3903_v6 = vld [vmem:[%s4876_s6 + $0x70] sm:$0xff]  ;;  %v3913_v9 = vld [vmem:[%s4876_s6 + $0x78] sm:$0xff] }
   0xb   :  { %3187 = vmatpush3.msra.mxu1 %v191_v8  ;;  %v53_v12 = vld [vmem:[%s4877_s7 + $0x8] sm:$0xff] }
  0xc4   :  { %v3176_v16 = vpop.f32.mrf.mxu0 }
  0xc5   :  { %v3749_v23 = vadd.f32 %v3176_v16, %v82_v18  ;;  %v52_v16 = vld [vmem:[%s4877_s7] sm:$0xff] }
  0xc6   :  { %v172_v21 = vpop.f32.mrf.mxu0 }
  0xc7   :  { %v3747_v22 = vadd.f32 %v172_v21, %v80_v17 }
  0xc8   :  { %v3179_v24 = vpop.f32.mrf.mxu0 }
  0xc9   :  { %3188 = vmatprep.mubr.msk.f32.mxu1 %vm217_vm2, %v3747_v22  ;;  %v3759_v29 = vadd.f32 %v3179_v24, %v86_v26 }
  0xca   :  { %v182_v27 = vpop.f32.mrf.mxu0  ;;  %3189 = vmatmul.mubr.msk.f32.vlgmr.msra.gmra.mxu1 %vm217_vm2, %v3749_v23 }
  0xcb   :  { %v3757_v28 = vadd.f32 %v182_v27, %v84_v25  ;;  %v54_v25 = vld [vmem:[%s4877_s7 + $0x10] sm:$0xff] }
  0xcd   :  { %3191 = vmatprep.mubr.msk.f32.mxu1 %vm217_vm2, %v3757_v28 }
  0xce   :  { %3192 = vmatmul.mubr.msk.f32.gmra.mxu1 %vm217_vm2, %v3759_v29 }
 0x18a   :  { %v3190_v31 = vpop.f32.mrf.mxu1 }
 0x18b   :  { %v3768_v32 = vadd.f32 %v3190_v31, %v2872_v30 }
 0x18c   :  { %v296_v33 = vpop.f32.mrf.mxu1 }
 0x18d   :  { %v3775_v35 = vadd.f32 %v2872_v30, %v296_v33  ;;  %337 = vrot.lane.b32.xlu1 %v3768_v32, %s3654_s12  ;;  %v316_v47 = vmul.f32 %v3768_v32, %v3802_v45  ;;  %v320_v55 = vmul.f32 %v3768_v32, %v3833_v53  ;;  %v324_v63 = vmul.f32 %v3768_v32, %v3865_v61  ;;  %v55_v33 = vld [vmem:[%s4877_s7 + $0x18] sm:$0xff] }
 0x18e   :  { %v3193_v36 = vpop.f32.mrf.mxu1  ;;  %v328_v7 = vmul.f32 %v3768_v32, %v3897_v5 }
 0x18f   :  { %v3779_v37 = vadd.f32 %v3193_v36, %v2872_v30  ;;  %v315_v38 = vmul.f32 %v3775_v35, %v3773_v34  ;;  %v319_v52 = vmul.f32 %v3775_v35, %v3823_v50  ;;  %v323_v60 = vmul.f32 %v3775_v35, %v3855_v58 }
 0x190   :  { %v306_v39 = vpop.f32.mrf.mxu1  ;;  %v327_v4 = vmul.f32 %v3775_v35, %v3887_v2 }
 0x191   :  { %341 = vrot.lane.b32.xlu0 %v3779_v37, %s3654_s12  ;;  %335 = vrot.lane.b32.xlu1 %v3775_v35, %s3654_s12  ;;  %v3788_v40 = vadd.f32 %v2872_v30, %v306_v39  ;;  %v318_v51 = vmul.f32 %v3779_v37, %v3817_v49  ;;  %v322_v59 = vmul.f32 %v3779_v37, %v3849_v57 }
 0x192   :  { %3202 = vmatprep.mubr.msk.f32.mxu0 %vm217_vm2, %v315_v38  ;;  %v326_v3 = vmul.f32 %v3779_v37, %v3881_v1  ;;  %v330_v10 = vmul.f32 %v3779_v37, %v3913_v9 }
 0x193   :  { %v317_v48 = vmul.f32 %v3788_v40, %v3807_v46  ;;  %v321_v56 = vmul.f32 %v3788_v40, %v3839_v54  ;;  %v325_v0 = vmul.f32 %v3788_v40, %v3871_v62  ;;  %v329_v8 = vmul.f32 %v3788_v40, %v3903_v6 }
 0x195   :  { %339 = vrot.lane.b32.xlu0 %v3788_v40, %s3654_s12 }
 0x1ff   :  { %v338_v42 = vpop.permute.xlu1 %337 }
 0x203   :  { %v342_v41 = vpop.permute.xlu0 %341  ;;  %v336_v44 = vpop.permute.xlu1 %335 }
 0x204   :  { %3194 = vmatprep.subr.msk.mxu0 %vm217_vm2, %v342_v41 }
 0x205   :  { %3195 = vmatpush3.xpose.msk.msra.mxu0 %vm217_vm2, %v342_v41  ;;  %v56_v41 = vld [vmem:[%s4877_s7 + $0x20] sm:$0xff] }
 0x207   :  { %v340_v43 = vpop.permute.xlu0 %339 }
 0x208   :  { %3196 = vmatprep.subr.msk.mxu0 %vm217_vm2, %v340_v43 }
 0x209   :  { %3197 = vmatpush3.xpose.msk.msra.mxu0 %vm217_vm2, %v340_v43 }
 0x20a   :  { %3198 = vmatprep.subr.msk.mxu0 %vm217_vm2, %v338_v42 }
 0x20d   :  { %3199 = vmatpush3.xpose.msk.msra.mxu0 %vm217_vm2, %v338_v42 }
 0x20e   :  { %3200 = vmatprep.subr.msk.mxu0 %vm217_vm2, %v336_v44 }
 0x211   :  { %3201 = vmatpush3.xpose.msk.msra.mxu0 %vm217_vm2, %v336_v44 }
 0x214   :  { %3203 = vmatmul.mubr.msk.f32.vlgmr.msra.gmra.mxu0 %vm217_vm2, %v316_v47  ;;  %v57_v47 = vld [vmem:[%s4877_s7 + $0x28] sm:$0xff] }
 0x215   :  { %3205 = vmatprep.mubr.msk.f32.mxu0 %vm217_vm2, %v317_v48 }
 0x218   :  { %3206 = vmatmul.mubr.msk.f32.gmra.mxu0 %vm217_vm2, %v318_v51 }
 0x219   :  { %3208 = vmatprep.mubr.msk.f32.mxu0 %vm217_vm2, %v319_v52 }
 0x21c   :  { %3209 = vmatmul.mubr.msk.f32.gmra.mxu0 %vm217_vm2, %v320_v55 }
 0x21d   :  { %3211 = vmatprep.mubr.msk.f32.mxu0 %vm217_vm2, %v321_v56  ;;  %v58_v56 = vld [vmem:[%s4877_s7 + $0x30] sm:$0xff] }
 0x220   :  { %3212 = vmatmul.mubr.msk.f32.gmra.mxu0 %vm217_vm2, %v322_v59 }
 0x221   :  { %3214 = vmatprep.mubr.msk.f32.mxu0 %vm217_vm2, %v323_v60 }
 0x224   :  { %3215 = vmatmul.mubr.msk.f32.gmra.mxu0 %vm217_vm2, %v324_v63 }
 0x225   :  { %3217 = vmatprep.mubr.msk.f32.mxu0 %vm217_vm2, %v325_v0 }
 0x228   :  { %3218 = vmatmul.mubr.msk.f32.gmra.mxu0 %vm217_vm2, %v326_v3 }
 0x229   :  { %3220 = vmatprep.mubr.msk.f32.mxu0 %vm217_vm2, %v327_v4  ;;  %v59_v4 = vld [vmem:[%s4877_s7 + $0x38] sm:$0xff] }
 0x22c   :  { %3221 = vmatmul.mubr.msk.f32.gmra.mxu0 %vm217_vm2, %v328_v7 }
 0x22d   :  { %3223 = vmatprep.mubr.msk.f32.mxu0 %vm217_vm2, %v329_v8 }
 0x230   :  { %3224 = vmatmul.mubr.msk.f32.gmra.mxu0 %vm217_vm2, %v330_v10 }
 0x2d4   :  { %v3204_v11 = vpop.f32.mrf.mxu0 }
 0x2d5   :  { %v545_v13 = vmul.f32 0.35355338, %v3204_v11  ;;  %v60_v11 = vld [vmem:[%s4877_s7 + $0x40] sm:$0xff] }
 0x2d6   :  { %v465_v14 = vpop.f32.mrf.mxu0 }
 0x2d7   :  { %v544_v17 = vmul.f32 0.35355338, %v465_v14  ;;  %v3926_v18 = vadd.f32 %v545_v13, %v53_v12 }
 0x2d8   :  { %v3207_v19 = vpop.f32.mrf.mxu0 }
 0x2d9   :  { %v579_v20 = vsel %vm217_vm2, %v3926_v18, -inf  ;;  %v3930_v21 = vadd.f32 %v544_v17, %v52_v16  ;;  %v547_v26 = vmul.f32 0.35355338, %v3207_v19  ;;  %v61_v19 = vld [vmem:[%s4877_s7 + $0x48] sm:$0xff] }
 0x2da   :  { %580 = vmax.xlane.f32.xlu1 %v579_v20  ;;  %v475_v24 = vpop.f32.mrf.mxu0 }
 0x2db   :  { %v546_v27 = vmul.f32 0.35355338, %v475_v24  ;;  %v576_v30 = vsel %vm217_vm2, %v3930_v21, -inf  ;;  %v3947_v44 = vadd.f32 %v547_v26, %v55_v33  ;;  %v62_v26 = vld [vmem:[%s4877_s7 + $0x50] sm:$0xff] }
 0x2dc   :  { %577 = vmax.xlane.f32.xlu0 %v576_v30  ;;  %v3210_v31 = vpop.f32.mrf.mxu0 }
 0x2dd   :  { %v3940_v36 = vadd.f32 %v546_v27, %v54_v25  ;;  %v549_v38 = vmul.f32 0.35355338, %v3210_v31  ;;  %v585_v63 = vsel %vm217_vm2, %v3947_v44, -inf }
 0x2de   :  { %v485_v39 = vpop.f32.mrf.mxu0 }
 0x2df   :  { %v548_v42 = vmul.f32 0.35355338, %v485_v39  ;;  %v582_v43 = vsel %vm217_vm2, %v3940_v36, -inf  ;;  %v3954_v55 = vadd.f32 %v549_v38, %v57_v47  ;;  %v63_v38 = vld [vmem:[%s4877_s7 + $0x58] sm:$0xff]  ;;  %v64_v47 = vld [vmem:[%s4877_s7 + $0x60] sm:$0xff] }
 0x2e0   :  { %583 = vmax.xlane.f32.xlu0 %v582_v43  ;;  %v3213_v48 = vpop.f32.mrf.mxu0 }
 0x2e1   :  { %v3952_v51 = vadd.f32 %v548_v42, %v56_v41  ;;  %v551_v59 = vmul.f32 0.35355338, %v3213_v48  ;;  %v591_v10 = vsel %vm217_vm2, %v3954_v55, -inf }
 0x2e2   :  { %v495_v52 = vpop.f32.mrf.mxu0 }
 0x2e3   :  { %v550_v60 = vmul.f32 0.35355338, %v495_v52  ;;  %v588_v0 = vsel %vm217_vm2, %v3952_v51, -inf  ;;  %v3975_v16 = vadd.f32 %v551_v59, %v59_v4 }
 0x2e4   :  { %586 = vmax.xlane.f32.xlu0 %v585_v63  ;;  %589 = vmax.xlane.f32.xlu1 %v588_v0  ;;  %v3216_v3 = vpop.f32.mrf.mxu0  ;;  %v65_v63 = vld [vmem:[%s4877_s7 + $0x68] sm:$0xff] }
 0x2e5   :  { %v3966_v7 = vadd.f32 %v550_v60, %v58_v56  ;;  %v553_v12 = vmul.f32 0.35355338, %v3216_v3  ;;  %v597_v30 = vsel %vm217_vm2, %v3975_v16, -inf }
 0x2e6   :  { %v505_v8 = vpop.f32.mrf.mxu0 }
 0x2e7   :  { %v552_v13 = vmul.f32 0.35355338, %v505_v8  ;;  %v594_v14 = vsel %vm217_vm2, %v3966_v7, -inf  ;;  %v3989_v33 = vadd.f32 %v553_v12, %v61_v19  ;;  %v66_v8 = vld [vmem:[%s4877_s7 + $0x70] sm:$0xff] }
 0x2e8   :  { %592 = vmax.xlane.f32.xlu0 %v591_v10  ;;  %595 = vmax.xlane.f32.xlu1 %v594_v14  ;;  %v3219_v17 = vpop.f32.mrf.mxu0  ;;  %v67_v14 = vld [vmem:[%s4877_s7 + $0x78] sm:$0xff] }
 0x2e9   :  { %v3980_v20 = vadd.f32 %v552_v13, %v60_v11  ;;  %v555_v24 = vmul.f32 0.35355338, %v3219_v17  ;;  %v603_v56 = vsel %vm217_vm2, %v3989_v33, -inf }
 0x2ea   :  { %v515_v25 = vpop.f32.mrf.mxu0 }
 0x2eb   :  { %v554_v27 = vmul.f32 0.35355338, %v515_v25  ;;  %v600_v31 = vsel %vm217_vm2, %v3980_v20, -inf  ;;  %v3996_v43 = vadd.f32 %v555_v24, %v63_v38 }
 0x2ec   :  { %598 = vmax.xlane.f32.xlu0 %v597_v30  ;;  %601 = vmax.xlane.f32.xlu1 %v600_v31  ;;  %v3222_v39 = vpop.f32.mrf.mxu0 }
 0x2ed   :  { %v3994_v41 = vadd.f32 %v554_v27, %v62_v26  ;;  %v557_v48 = vmul.f32 0.35355338, %v3222_v39  ;;  %v609_v4 = vsel %vm217_vm2, %v3996_v43, -inf }
 0x2ee   :  { %v525_v42 = vpop.f32.mrf.mxu0 }
 0x2ef   :  { %v556_v52 = vmul.f32 0.35355338, %v525_v42  ;;  %v606_v59 = vsel %vm217_vm2, %v3994_v41, -inf  ;;  %v4017_v13 = vadd.f32 %v557_v48, %v65_v63 }
 0x2f0   :  { %604 = vmax.xlane.f32.xlu0 %v603_v56  ;;  %607 = vmax.xlane.f32.xlu1 %v606_v59  ;;  %v3225_v60 = vpop.f32.mrf.mxu0 }
 0x2f1   :  { %v4008_v0 = vadd.f32 %v556_v52, %v64_v47  ;;  %v559_v10 = vmul.f32 0.35355338, %v3225_v60  ;;  %v615_v19 = vsel %vm217_vm2, %v4017_v13, -inf }
 0x2f2   :  { %v535_v3 = vpop.f32.mrf.mxu0 }
 0x2f3   :  { %v558_v11 = vmul.f32 0.35355338, %v535_v3  ;;  %v612_v12 = vsel %vm217_vm2, %v4008_v0, -inf  ;;  %v4028_v25 = vadd.f32 %v559_v10, %v67_v14 }
 0x2f4   :  { %610 = vmax.xlane.f32.xlu0 %v609_v4  ;;  %613 = vmax.xlane.f32.xlu1 %v612_v12 }
 0x2f5   :  { %v4022_v17 = vadd.f32 %v558_v11, %v66_v8  ;;  %v621_v26 = vsel %vm217_vm2, %v4028_v25, -inf }
 0x2f7   :  { %v618_v24 = vsel %vm217_vm2, %v4022_v17, -inf }
 0x2f8   :  { %616 = vmax.xlane.f32.xlu0 %v615_v19  ;;  %619 = vmax.xlane.f32.xlu1 %v618_v24 }
 0x2fc   :  { %622 = vmax.xlane.f32.xlu0 %v621_v26 }
 0x309   :  { %758 = vrot.lane.b32.xlu1 %v3779_v37, %s3655_s30 }
 0x30d   :  { %754 = vrot.lane.b32.xlu1 %v3768_v32, %s3655_s30 }
 0x312   :  { %756 = vrot.lane.b32.xlu0 %v3788_v40, %s3655_s30 }
 0x316   :  { %752 = vrot.lane.b32.xlu0 %v3775_v35, %s3655_s30 }
 0x363   :  { %v581_v27 = vpop.xlane.xlu1 %580 }
 0x364   :  { %v625_v30 = vsub.f32 %v3926_v18, %v581_v27 }
 0x365   :  { %v578_v31 = vpop.xlane.xlu0 %577 }
 0x366   :  { %v642_v38 = vmul.f32 1.442695, %v625_v30  ;;  %v624_v39 = vsub.f32 %v3930_v21, %v578_v31 }
 0x368   :  { %3452 = vpow2.f32 %v642_v38  ;;  %v640_v42 = vmul.f32 1.442695, %v624_v39 }
 0x369   :  { %v584_v47 = vpop.xlane.xlu0 %583 }
 0x36a   :  { %3454 = vpow2.f32 %v640_v42  ;;  %v626_v37 = vsub.f32 %v3940_v36, %v584_v47 }
 0x36c   :  { %v644_v32 = vmul.f32 1.442695, %v626_v37 }
 0x36d   :  { %v587_v48 = vpop.xlane.xlu0 %586  ;;  %v590_v52 = vpop.xlane.xlu1 %589 }
 0x36e   :  { %3456 = vpow2.f32 %v644_v32  ;;  %v627_v40 = vsub.f32 %v3947_v44, %v587_v48  ;;  %v628_v35 = vsub.f32 %v3952_v51, %v590_v52 }
 0x370   :  { %v646_v56 = vmul.f32 1.442695, %v627_v40  ;;  %v648_v18 = vmul.f32 1.442695, %v628_v35 }
 0x371   :  { %v593_v59 = vpop.xlane.xlu0 %592  ;;  %v596_v60 = vpop.xlane.xlu1 %595 }
 0x372   :  { %3458 = vpow2.f32 %v646_v56  ;;  %v629_v21 = vsub.f32 %v3954_v55, %v593_v59  ;;  %v630_v63 = vsub.f32 %v3966_v7, %v596_v60 }
 0x373   :  { %3460 = vpow2.f32 %v648_v18 }
 0x374   :  { %v650_v3 = vmul.f32 1.442695, %v629_v21  ;;  %v652_v36 = vmul.f32 1.442695, %v630_v63 }
 0x375   :  { %v4047_v4 = vpop.eup %3452  ;;  %v599_v8 = vpop.xlane.xlu0 %598 }
 0x376   :  { %v602_v10 = vpop.xlane.xlu1 %601  ;;  %3462 = vpow2.f32 %v650_v3  ;;  %v631_v44 = vsub.f32 %v3975_v16, %v599_v8  ;;  %v675_v11 = vsel %vm217_vm2, %v4047_v4, 0.0 }
 0x377   :  { %v632_v51 = vsub.f32 %v3980_v20, %v602_v10  ;;  %v4053_v12 = vpop.eup %3454  ;;  %3464 = vpow2.f32 %v652_v36  ;;  %676 = vadd.xlane.f32.xlu0 %v675_v11 }
 0x378   :  { %v654_v55 = vmul.f32 1.442695, %v631_v44  ;;  %v672_v14 = vsel %vm217_vm2, %v4053_v12, 0.0 }
 0x379   :  { %v656_v7 = vmul.f32 1.442695, %v632_v51  ;;  %v605_v19 = vpop.xlane.xlu0 %604  ;;  %673 = vadd.xlane.f32.xlu1 %v672_v14 }
 0x37a   :  { %v608_v24 = vpop.xlane.xlu1 %607  ;;  %3466 = vpow2.f32 %v654_v55  ;;  %v633_v16 = vsub.f32 %v3989_v33, %v605_v19 }
 0x37b   :  { %v634_v20 = vsub.f32 %v3994_v41, %v608_v24  ;;  %v4059_v26 = vpop.eup %3456  ;;  %3468 = vpow2.f32 %v656_v7 }
 0x37c   :  { %v658_v27 = vmul.f32 1.442695, %v633_v16  ;;  %v678_v31 = vsel %vm217_vm2, %v4059_v26, 0.0 }
 0x37d   :  { %v660_v30 = vmul.f32 1.442695, %v634_v20  ;;  %v611_v38 = vpop.xlane.xlu0 %610  ;;  %679 = vadd.xlane.f32.xlu1 %v678_v31 }
 0x37e   :  { %v614_v39 = vpop.xlane.xlu1 %613  ;;  %3470 = vpow2.f32 %v658_v27  ;;  %v635_v42 = vsub.f32 %v3996_v43, %v611_v38 }
 0x37f   :  { %v636_v47 = vsub.f32 %v4008_v0, %v614_v39  ;;  %v4065_v37 = vpop.eup %3458  ;;  %3472 = vpow2.f32 %v660_v30 }
 0x380   :  { %v4067_v33 = vpop.eup %3460  ;;  %v662_v41 = vmul.f32 1.442695, %v635_v42  ;;  %v681_v48 = vsel %vm217_vm2, %v4065_v37, 0.0 }
 0x381   :  { %v664_v32 = vmul.f32 1.442695, %v636_v47  ;;  %v617_v52 = vpop.xlane.xlu0 %616  ;;  %682 = vadd.xlane.f32.xlu0 %v681_v48  ;;  %v684_v40 = vsel %vm217_vm2, %v4067_v33, 0.0 }
 0x382   :  { %v620_v35 = vpop.xlane.xlu1 %619  ;;  %3474 = vpow2.f32 %v662_v41  ;;  %v637_v43 = vsub.f32 %v4017_v13, %v617_v52  ;;  %685 = vadd.xlane.f32.xlu1 %v684_v40 }
 0x383   :  { %v638_v0 = vsub.f32 %v4022_v17, %v620_v35  ;;  %v4075_v56 = vpop.eup %3462  ;;  %3476 = vpow2.f32 %v664_v32 }
 0x384   :  { %v4077_v18 = vpop.eup %3464  ;;  %v666_v59 = vmul.f32 1.442695, %v637_v43  ;;  %v687_v21 = vsel %vm217_vm2, %v4075_v56, 0.0 }
 0x385   :  { %v668_v60 = vmul.f32 1.442695, %v638_v0  ;;  %688 = vadd.xlane.f32.xlu0 %v687_v21  ;;  %v623_v63 = vpop.xlane.xlu0 %622  ;;  %v690_v3 = vsel %vm217_vm2, %v4077_v18, 0.0 }
 0x386   :  { %v759_v36 = vpop.permute.xlu1 %758  ;;  %3478 = vpow2.f32 %v666_v59  ;;  %v639_v13 = vsub.f32 %v4028_v25, %v623_v63  ;;  %691 = vadd.xlane.f32.xlu1 %v690_v3 }
 0x387   :  { %3226 = vmatprep.subr.mxu1 %v759_v36  ;;  %v4084_v17 = vpop.eup %3466  ;;  %3480 = vpow2.f32 %v668_v60 }
 0x388   :  { %3227 = vmatpush3.msra.mxu1 %v759_v36  ;;  %v4086_v8 = vpop.eup %3468  ;;  %v670_v10 = vmul.f32 1.442695, %v639_v13  ;;  %v693_v44 = vsel %vm217_vm2, %v4084_v17, 0.0 }
 0x389   :  { %694 = vadd.xlane.f32.xlu0 %v693_v44  ;;  %v757_v51 = vpop.permute.xlu0 %756  ;;  %v696_v11 = vsel %vm217_vm2, %v4086_v8, 0.0 }
 0x38a   :  { %3482 = vpow2.f32 %v670_v10  ;;  %697 = vadd.xlane.f32.xlu1 %v696_v11  ;;  %3228 = vmatprep.subr.mxu1 %v757_v51  ;;  %v755_v55 = vpop.permute.xlu1 %754 }
 0x38b   :  { %v4092_v25 = vpop.eup %3470  ;;  %3229 = vmatpush3.msra.mxu1 %v757_v51 }
 0x38c   :  { %v4094_v7 = vpop.eup %3472  ;;  %3230 = vmatprep.subr.mxu1 %v755_v55  ;;  %v699_v14 = vsel %vm217_vm2, %v4092_v25, 0.0 }
 0x38d   :  { %700 = vadd.xlane.f32.xlu0 %v699_v14  ;;  %v753_v19 = vpop.permute.xlu0 %752  ;;  %v702_v24 = vsel %vm217_vm2, %v4094_v7, 0.0  ;;  %3231 = vmatpush3.msra.mxu1 %v755_v55 }
 0x38e   :  { %703 = vadd.xlane.f32.xlu1 %v702_v24  ;;  %3232 = vmatprep.subr.mxu1 %v753_v19 }
 0x38f   :  { %v4100_v16 = vpop.eup %3474  ;;  %3233 = vmatpush3.msra.mxu1 %v753_v19 }
 0x390   :  { %v4102_v20 = vpop.eup %3476  ;;  %v705_v27 = vsel %vm217_vm2, %v4100_v16, 0.0 }
 0x391   :  { %706 = vadd.xlane.f32.xlu0 %v705_v27  ;;  %v708_v30 = vsel %vm217_vm2, %v4102_v20, 0.0 }
 0x392   :  { %709 = vadd.xlane.f32.xlu1 %v708_v30 }
 0x393   :  { %v4108_v31 = vpop.eup %3478 }
 0x394   :  { %v4110_v38 = vpop.eup %3480  ;;  %v711_v39 = vsel %vm217_vm2, %v4108_v31, 0.0 }
 0x395   :  { %712 = vadd.xlane.f32.xlu0 %v711_v39  ;;  %v714_v42 = vsel %vm217_vm2, %v4110_v38, 0.0 }
 0x396   :  { %715 = vadd.xlane.f32.xlu1 %v714_v42 }
 0x397   :  { %v4116_v47 = vpop.eup %3482 }
 0x398   :  { %v717_v41 = vsel %vm217_vm2, %v4116_v47, 0.0 }
 0x399   :  { %718 = vadd.xlane.f32.xlu0 %v717_v41 }
 0x400   :  { %v677_v32 = vpop.xlane.xlu0 %676 }
 0x401   :  { %3484 = vrcp.f32 %v677_v32 }
 0x402   :  { %v674_v48 = vpop.xlane.xlu1 %673 }
 0x403   :  { %3486 = vrcp.f32 %v674_v48 }
 0x406   :  { %v680_v52 = vpop.xlane.xlu1 %679 }
 0x407   :  { %3488 = vrcp.f32 %v680_v52 }
 0x40a   :  { %v683_v40 = vpop.xlane.xlu0 %682 }
 0x40b   :  { %3490 = vrcp.f32 %v683_v40  ;;  %v686_v35 = vpop.xlane.xlu1 %685 }
 0x40c   :  { %3492 = vrcp.f32 %v686_v35 }
 0x40e   :  { %v689_v43 = vpop.xlane.xlu0 %688  ;;  %v3485_v0 = vpop.eup %3484 }
 0x40f   :  { %3494 = vrcp.f32 %v689_v43  ;;  %v692_v59 = vpop.xlane.xlu1 %691  ;;  %v737_v63 = vmul.f32 %v3485_v0, %v4047_v4 }
 0x410   :  { %v3487_v60 = vpop.eup %3486  ;;  %3496 = vrcp.f32 %v692_v59 }
 0x411   :  { %v736_v21 = vmul.f32 %v3487_v60, %v4053_v12 }
 0x412   :  { %v695_v3 = vpop.xlane.xlu0 %694 }
 0x413   :  { %3498 = vrcp.f32 %v695_v3  ;;  %v698_v36 = vpop.xlane.xlu1 %697  ;;  %3234 = vmatprep.mubr.msk.f32.mxu1 %vm217_vm2, %v736_v21 }
 0x414   :  { %v3489_v13 = vpop.eup %3488  ;;  %3500 = vrcp.f32 %v698_v36  ;;  %3235 = vmatmul.mubr.msk.f32.vlgmr.msra.gmra.mxu1 %vm217_vm2, %v737_v63 }
 0x415   :  { %v738_v10 = vmul.f32 %v3489_v13, %v4059_v26 }
 0x416   :  { %v701_v44 = vpop.xlane.xlu0 %700 }
 0x417   :  { %3502 = vrcp.f32 %v701_v44  ;;  %v704_v51 = vpop.xlane.xlu1 %703  ;;  %3237 = vmatprep.mubr.msk.f32.mxu1 %vm217_vm2, %v738_v10 }
 0x418   :  { %v3491_v11 = vpop.eup %3490  ;;  %3504 = vrcp.f32 %v704_v51 }
 0x419   :  { %v3493_v12 = vpop.eup %3492  ;;  %v739_v4 = vmul.f32 %v3491_v11, %v4065_v37 }
 0x41a   :  { %v707_v55 = vpop.xlane.xlu0 %706  ;;  %v740_v14 = vmul.f32 %v3493_v12, %v4067_v33 }
 0x41b   :  { %3506 = vrcp.f32 %v707_v55  ;;  %v710_v19 = vpop.xlane.xlu1 %709  ;;  %3238 = vmatmul.mubr.msk.f32.gmra.mxu1 %vm217_vm2, %v739_v4 }
 0x41c   :  { %v3495_v24 = vpop.eup %3494  ;;  %3508 = vrcp.f32 %v710_v19  ;;  %3240 = vmatprep.mubr.msk.f32.mxu1 %vm217_vm2, %v740_v14 }
 0x41d   :  { %v3497_v26 = vpop.eup %3496  ;;  %v741_v27 = vmul.f32 %v3495_v24, %v4075_v56 }
 0x41e   :  { %v713_v30 = vpop.xlane.xlu0 %712  ;;  %v742_v39 = vmul.f32 %v3497_v26, %v4077_v18 }
 0x41f   :  { %3510 = vrcp.f32 %v713_v30  ;;  %v716_v42 = vpop.xlane.xlu1 %715  ;;  %3241 = vmatmul.mubr.msk.f32.gmra.mxu1 %vm217_vm2, %v741_v27 }
 0x420   :  { %v3499_v37 = vpop.eup %3498  ;;  %3512 = vrcp.f32 %v716_v42  ;;  %3243 = vmatprep.mubr.msk.f32.mxu1 %vm217_vm2, %v742_v39 }
 0x421   :  { %v3501_v33 = vpop.eup %3500  ;;  %v743_v41 = vmul.f32 %v3499_v37, %v4084_v17 }
 0x422   :  { %v719_v32 = vpop.xlane.xlu0 %718  ;;  %v744_v48 = vmul.f32 %v3501_v33, %v4086_v8 }
 0x423   :  { %3514 = vrcp.f32 %v719_v32  ;;  %3244 = vmatmul.mubr.msk.f32.gmra.mxu1 %vm217_vm2, %v743_v41 }
 0x424   :  { %v3503_v56 = vpop.eup %3502  ;;  %3246 = vmatprep.mubr.msk.f32.mxu1 %vm217_vm2, %v744_v48 }
 0x425   :  { %v3505_v18 = vpop.eup %3504  ;;  %v745_v52 = vmul.f32 %v3503_v56, %v4092_v25 }
 0x426   :  { %v746_v40 = vmul.f32 %v3505_v18, %v4094_v7 }
 0x427   :  { %3247 = vmatmul.mubr.msk.f32.gmra.mxu1 %vm217_vm2, %v745_v52 }
 0x428   :  { %v3507_v35 = vpop.eup %3506  ;;  %3249 = vmatprep.mubr.msk.f32.mxu1 %vm217_vm2, %v746_v40 }
 0x429   :  { %v3509_v17 = vpop.eup %3508  ;;  %v747_v43 = vmul.f32 %v3507_v35, %v4100_v16  ;;  %v199_v16 = vld [vmem:[%s4878_s3 + $0x18] sm:$0xff] }
 0x42a   :  { %v748_v8 = vmul.f32 %v3509_v17, %v4102_v20  ;;  %3258 = vmatprep.subr.mxu1 %v199_v16  ;;  %v198_v20 = vld [vmem:[%s4878_s3 + $0x10] sm:$0xff] }
 0x42b   :  { %3250 = vmatmul.mubr.msk.f32.gmra.mxu1 %vm217_vm2, %v747_v43 }
 0x42c   :  { %v3511_v0 = vpop.eup %3510  ;;  %3252 = vmatprep.mubr.msk.f32.mxu1 %vm217_vm2, %v748_v8  ;;  %3259 = vmatpush3.msra.mxu1 %v199_v16 }
 0x42d   :  { %v3513_v59 = vpop.eup %3512  ;;  %v749_v25 = vmul.f32 %v3511_v0, %v4108_v31  ;;  %3260 = vmatprep.subr.mxu1 %v198_v20  ;;  %v197_v31 = vld [vmem:[%s4878_s3 + $0x8] sm:$0xff] }
 0x42e   :  { %v750_v7 = vmul.f32 %v3513_v59, %v4110_v38  ;;  %3261 = vmatpush3.msra.mxu1 %v198_v20  ;;  %v196_v38 = vld [vmem:[%s4878_s3] sm:$0xff] }
 0x42f   :  { %3253 = vmatmul.mubr.msk.f32.gmra.mxu1 %vm217_vm2, %v749_v25  ;;  %3262 = vmatprep.subr.mxu1 %v197_v31 }
 0x430   :  { %v3515_v60 = vpop.eup %3514  ;;  %3255 = vmatprep.mubr.msk.f32.mxu1 %vm217_vm2, %v750_v7  ;;  %3263 = vmatpush3.msra.mxu1 %v197_v31 }
 0x431   :  { %v751_v21 = vmul.f32 %v3515_v60, %v4116_v47  ;;  %3264 = vmatprep.subr.mxu1 %v196_v38 }
 0x432   :  { %3265 = vmatpush3.msra.mxu1 %v196_v38 }
 0x433   :  { %3256 = vmatmul.mubr.msk.f32.gmra.mxu1 %vm217_vm2, %v751_v21 }
 0x4d4   :  { %v3236_v47 = vpop.f32.mrf.mxu1 }
 0x4d5   :  { %v958_v27 = vmul.f32 %v3236_v47, %v3802_v45 }
 0x4d6   :  { %v878_v63 = vpop.f32.mrf.mxu1 }
 0x4d7   :  { %v957_v24 = vmul.f32 %v878_v63, %v3773_v34 }
 0x4db   :  { %v3239_v3 = vpop.f32.mrf.mxu1 }
 0x4dc   :  { %v960_v45 = vmul.f32 %v3239_v3, %v3817_v49 }
 0x4dd   :  { %v888_v36 = vpop.f32.mrf.mxu1 }
 0x4df   :  { %v3242_v13 = vpop.f32.mrf.mxu1 }
 0x4e0   :  { %v962_v14 = vmul.f32 %v3242_v13, %v3833_v53  ;;  %v959_v53 = vmul.f32 %v888_v36, %v3807_v46 }
 0x4e1   :  { %v898_v10 = vpop.f32.mrf.mxu1 }
 0x4e2   :  { %v961_v55 = vmul.f32 %v898_v10, %v3823_v50  ;;  %v974_v33 = vadd.f32 %v962_v14, %v958_v27 }
 0x4e3   :  { %v3245_v44 = vpop.f32.mrf.mxu1 }
 0x4e4   :  { %v973_v42 = vadd.f32 %v961_v55, %v957_v24  ;;  %v964_v41 = vmul.f32 %v3245_v44, %v3849_v57 }
 0x4e5   :  { %v908_v51 = vpop.f32.mrf.mxu1 }
 0x4e6   :  { %v963_v37 = vmul.f32 %v908_v51, %v3839_v54  ;;  %v976_v40 = vadd.f32 %v964_v41, %v960_v45  ;;  %v209_v41 = vld [vmem:[%s4879_s4 + $0x8] sm:$0xff] }
 0x4e7   :  { %v3248_v11 = vpop.f32.mrf.mxu1 }
 0x4e8   :  { %v966_v30 = vmul.f32 %v3248_v11, %v3865_v61  ;;  %v975_v54 = vadd.f32 %v963_v37, %v959_v53  ;;  %v206_v53 = vld [vmem:[%s4878_s3 + $0x50] sm:$0xff] }
 0x4e9   :  { %v918_v12 = vpop.f32.mrf.mxu1 }
 0x4ea   :  { %v965_v26 = vmul.f32 %v918_v12, %v3855_v58  ;;  %v978_v61 = vadd.f32 %v974_v33, %v966_v30  ;;  %v210_v33 = vld [vmem:[%s4879_s4 + $0x10] sm:$0xff] }
 0x4eb   :  { %v3251_v4 = vpop.f32.mrf.mxu1 }
 0x4ec   :  { %v977_v48 = vadd.f32 %v973_v42, %v965_v26  ;;  %v968_v56 = vmul.f32 %v3251_v4, %v3881_v1  ;;  %v985_v1 = vlaneseq }
 0x4ed   :  { %v928_v19 = vpop.f32.mrf.mxu1 }
 0x4ee   :  { %v967_v34 = vmul.f32 %v928_v19, %v3871_v62  ;;  %v980_v62 = vadd.f32 %v976_v40, %v968_v56  ;;  %v4184_v43 = vshrl.u32 %v985_v1, 7 }
 0x4ef   :  { %v3254_v39 = vpop.f32.mrf.mxu1 }
 0x4f0   :  { %v970_v50 = vmul.f32 %v3254_v39, %v3897_v5  ;;  %v979_v17 = vadd.f32 %v975_v54, %v967_v34  ;;  %v204_v34 = vld [vmem:[%s4878_s3 + $0x40] sm:$0xff]  ;;  %v1153_v1 = vsub.s32 7, %v4184_v43 }
 0x4f1   :  { %v938_v32 = vpop.f32.mrf.mxu1 }
 0x4f2   :  { %v969_v58 = vmul.f32 %v938_v32, %v3887_v2  ;;  %v982_v57 = vadd.f32 %v978_v61, %v970_v50  ;;  %v208_v50 = vld [vmem:[%s4879_s4] sm:$0xff]  ;;  %v207_v32 = vld [vmem:[%s4878_s3 + $0x58] sm:$0xff] }
 0x4f3   :  { %v3257_v18 = vpop.f32.mrf.mxu1  ;;  %3286 = vmatprep.subr.mxu1 %v207_v32 }
 0x4f4   :  { %v981_v52 = vadd.f32 %v977_v48, %v969_v58  ;;  %v972_v5 = vmul.f32 %v3257_v18, %v3913_v9  ;;  %v987_v9 = vsub.s32 4, %v4184_v43  ;;  %v205_v48 = vld [vmem:[%s4878_s3 + $0x48] sm:$0xff] }
 0x4f5   :  { %v948_v35 = vpop.f32.mrf.mxu1 }
 0x4f6   :  { %v971_v46 = vmul.f32 %v948_v35, %v3903_v6  ;;  %3266 = vmatprep.mubr.msk.f32.mxu1 %vm217_vm2, %v981_v52  ;;  %v984_v2 = vadd.f32 %v980_v62, %v972_v5  ;;  %v988_v6 = vrot.slane %v3742_v15, %v987_v9 }
 0x4f7   :  { %3267 = vmatmul.mubr.msk.f32.vlgmr.msra.gmra.mxu1 %vm217_vm2, %v982_v57 }
 0x4f8   :  { %v983_v49 = vadd.f32 %v979_v17, %v971_v46  ;;  %3287 = vmatpush3.msra.mxu1 %v207_v32  ;;  %v1145_v46 = vsub.s32 6, %v4184_v43 }
 0x4f9   :  { %3288 = vmatprep.subr.mxu1 %v206_v53 }
 0x4fa   :  { %3269 = vmatprep.mubr.msk.f32.mxu1 %vm217_vm2, %v983_v49  ;;  %3289 = vmatpush3.msra.mxu1 %v206_v53  ;;  %v3620_v49 = vld [vmem:[%s4873_s1 + $0x20] sm:$0xff] }
 0x4fb   :  { %3270 = vmatmul.mubr.msk.f32.gmra.mxu1 %vm217_vm2, %v984_v2  ;;  %3290 = vmatprep.subr.mxu1 %v205_v48  ;;  %v1146_v2 = vrot.slane %v3620_v49, %v1145_v46 }
 0x4fc   :  { %3291 = vmatpush3.msra.mxu1 %v205_v48 }
 0x4fd   :  { %3292 = vmatprep.subr.mxu1 %v204_v34 }
 0x4fe   :  { %3293 = vmatpush3.msra.mxu1 %v204_v34 }
 0x5b7   :  { %v3268_v8 = vpop.f32.mrf.mxu1 }
 0x5b8   :  { %v1073_v0 = vadd.f32 %v3268_v8, %v988_v6 }
 0x5b9   :  { %v1067_v59 = vpop.f32.mrf.mxu1 }
 0x5ba   :  { %v1068_v25 = vadd.f32 %v1067_v59, %v988_v6  ;;  %v1087_v7 = vadd.f32 %v1073_v0, %v3749_v23 }
 0x5bb   :  { %v3271_v60 = vpop.f32.mrf.mxu1 }
 0x5bc   :  { %v1083_v21 = vadd.f32 %v3271_v60, %v988_v6  ;;  %v1093_v16 = vsel %vm217_vm2, %v1087_v7, 0.0  ;;  %v1086_v20 = vadd.f32 %v1068_v25, %v3747_v22  ;;  %v211_v22 = vld [vmem:[%s4879_s4 + $0x18] sm:$0xff] }
 0x5bd   :  { %1094 = vadd.xlane.f32.xlu0 %v1093_v16  ;;  %v1077_v31 = vpop.f32.mrf.mxu1  ;;  %3272 = vmatprep.subr.mxu0 %v211_v22 }
 0x5be   :  { %v1078_v38 = vadd.f32 %v1077_v31, %v988_v6  ;;  %v1090_v47 = vsel %vm217_vm2, %v1086_v20, 0.0  ;;  %v1089_v63 = vadd.f32 %v1083_v21, %v3759_v29  ;;  %3273 = vmatpush3.msra.mxu0 %v211_v22  ;;  %v202_v22 = vld [vmem:[%s4878_s3 + $0x30] sm:$0xff] }
 0x5bf   :  { %1091 = vadd.xlane.f32.xlu1 %v1090_v47  ;;  %3274 = vmatprep.subr.mxu0 %v210_v33 }
 0x5c0   :  { %v1099_v15 = vsel %vm217_vm2, %v1089_v63, 0.0  ;;  %v1088_v3 = vadd.f32 %v1078_v38, %v3757_v28  ;;  %3275 = vmatpush3.msra.mxu0 %v210_v33 }
 0x5c1   :  { %1100 = vadd.xlane.f32.xlu0 %v1099_v15  ;;  %3276 = vmatprep.subr.mxu0 %v209_v41 }
 0x5c2   :  { %v1096_v23 = vsel %vm217_vm2, %v1088_v3, 0.0  ;;  %3277 = vmatpush3.msra.mxu0 %v209_v41 }
 0x5c3   :  { %1097 = vadd.xlane.f32.xlu1 %v1096_v23  ;;  %3278 = vmatprep.subr.mxu0 %v208_v50  ;;  %v203_v23 = vld [vmem:[%s4878_s3 + $0x38] sm:$0xff] }
 0x5c4   :  { %3279 = vmatpush3.msra.mxu0 %v208_v50  ;;  %3294 = vmatprep.subr.mxu1 %v203_v23 }
 0x5c5   :  { %3295 = vmatpush3.msra.mxu1 %v203_v23 }
 0x5c6   :  { %3296 = vmatprep.subr.mxu1 %v202_v22 }
 0x5c7   :  { %3297 = vmatpush3.msra.mxu1 %v202_v22 }
 0x646   :  { %v1095_v36 = vpop.xlane.xlu0 %1094 }
 0x647   :  { %v1104_v13 = vmul.f32 0.03125, %v1095_v36  ;;  %v201_v36 = vld [vmem:[%s4878_s3 + $0x28] sm:$0xff] }
 0x648   :  { %v1092_v10 = vpop.xlane.xlu1 %1091  ;;  %3298 = vmatprep.subr.mxu1 %v201_v36 }
 0x649   :  { %v4201_v44 = vsub.f32 %v1087_v7, %v1104_v13  ;;  %v1103_v29 = vmul.f32 0.03125, %v1092_v10  ;;  %v1154_v7 = vrot.slane %v3620_v49, %v1153_v1  ;;  %3299 = vmatpush3.msra.mxu1 %v201_v36  ;;  %v200_v13 = vld [vmem:[%s4878_s3 + $0x20] sm:$0xff] }
 0x64a   :  { %v1101_v51 = vpop.xlane.xlu0 %1100  ;;  %3300 = vmatprep.subr.mxu1 %v200_v13  ;;  %v2917_v10 = vld [vmem:[%s4879_s4 + $0x20] ss:$0 sm:$0xff] }
 0x64b   :  { %v1107_v11 = vsub.f32 %v1086_v20, %v1103_v29  ;;  %v1106_v12 = vmul.f32 0.03125, %v1101_v51  ;;  %v1112_v28 = vmul.f32 %v4201_v44, %v4201_v44  ;;  %3301 = vmatpush3.msra.mxu1 %v200_v13 }
 0x64c   :  { %v1098_v4 = vpop.xlane.xlu1 %1097 }
 0x64d   :  { %v4205_v55 = vsub.f32 %v1089_v63, %v1106_v12  ;;  %v1105_v14 = vmul.f32 0.03125, %v1098_v4  ;;  %v1118_v19 = vsel %vm217_vm2, %v1112_v28, 0.0  ;;  %v1111_v24 = vmul.f32 %v1107_v11, %v1107_v11 }
 0x64e   :  { %1119 = vadd.xlane.f32.xlu0 %v1118_v19 }
 0x64f   :  { %v1109_v26 = vsub.f32 %v1088_v3, %v1105_v14  ;;  %v1115_v27 = vsel %vm217_vm2, %v1111_v24, 0.0  ;;  %v1114_v30 = vmul.f32 %v4205_v55, %v4205_v55 }
 0x650   :  { %1116 = vadd.xlane.f32.xlu1 %v1115_v27  ;;  %v1266_v27 = vsub.s32 5, %v4184_v43 }
 0x651   :  { %v1124_v39 = vsel %vm217_vm2, %v1114_v30, 0.0  ;;  %v1113_v42 = vmul.f32 %v1109_v26, %v1109_v26 }
 0x652   :  { %1125 = vadd.xlane.f32.xlu0 %v1124_v39  ;;  %v1267_v30 = vrot.slane %v3620_v49, %v1266_v27 }
 0x653   :  { %v1121_v37 = vsel %vm217_vm2, %v1113_v42, 0.0 }
 0x654   :  { %1122 = vadd.xlane.f32.xlu1 %v1121_v37 }
 0x6d7   :  { %v1120_v58 = vpop.xlane.xlu0 %1119 }
 0x6d8   :  { %v1128_v45 = vmul.f32 0.03125, %v1120_v58 }
 0x6d9   :  { %v1117_v61 = vpop.xlane.xlu1 %1116 }
 0x6da   :  { %v1132_v56 = vadd.f32 1e-05, %v1128_v45  ;;  %v1127_v18 = vmul.f32 0.03125, %v1117_v61 }
 0x6db   :  { %v1126_v54 = vpop.xlane.xlu0 %1125 }
 0x6dc   :  { %3516 = vrsqrt.f32 %v1132_v56  ;;  %v1131_v52 = vadd.f32 1e-05, %v1127_v18  ;;  %v1130_v40 = vmul.f32 0.03125, %v1126_v54 }
 0x6dd   :  { %v1123_v57 = vpop.xlane.xlu1 %1122 }
 0x6de   :  { %3518 = vrsqrt.f32 %v1131_v52  ;;  %v1134_v5 = vadd.f32 1e-05, %v1130_v40  ;;  %v1129_v35 = vmul.f32 0.03125, %v1123_v57 }
 0x6e0   :  { %3520 = vrsqrt.f32 %v1134_v5  ;;  %v1133_v17 = vadd.f32 1e-05, %v1129_v35 }
 0x6e2   :  { %3522 = vrsqrt.f32 %v1133_v17 }
 0x6e9   :  { %v3517_v62 = vpop.eup %3516 }
 0x6ea   :  { %v1140_v6 = vmul.f32 %v3517_v62, %v4201_v44 }
 0x6eb   :  { %v3519_v8 = vpop.eup %3518 }
 0x6ec   :  { %v1139_v0 = vmul.f32 %v3519_v8, %v1107_v11  ;;  %v1148_v25 = vmul.f32 %v1146_v2, %v1140_v6 }
 0x6ed   :  { %v3521_v59 = vpop.eup %3520 }
 0x6ee   :  { %v1147_v60 = vmul.f32 %v1146_v2, %v1139_v0  ;;  %v1142_v21 = vmul.f32 %v3521_v59, %v4205_v55  ;;  %v1156_v38 = vadd.f32 %v1154_v7, %v1148_v25 }
 0x6ef   :  { %v3523_v16 = vpop.eup %3522 }
 0x6f0   :  { %v1155_v20 = vadd.f32 %v1154_v7, %v1147_v60  ;;  %v1141_v31 = vmul.f32 %v3523_v16, %v1109_v26  ;;  %v1150_v47 = vmul.f32 %v1146_v2, %v1142_v21 }
 0x6f2   :  { %3280 = vmatprep.mubr.msk.f32.mxu0 %vm217_vm2, %v1155_v20  ;;  %v1149_v63 = vmul.f32 %v1146_v2, %v1141_v31  ;;  %v1158_v3 = vadd.f32 %v1154_v7, %v1150_v47  ;;  %v2928_v47 = vld [vmem:[%s4875_s2 + $0x38] sm:$0xff] }
 0x6f3   :  { %3281 = vmatmul.mubr.msk.f32.vlgmr.msra.gmra.mxu0 %vm217_vm2, %v1156_v38 }
 0x6f4   :  { %v1157_v15 = vadd.f32 %v1154_v7, %v1149_v63  ;;  %v2927_v63 = vld [vmem:[%s4875_s2 + $0x30] sm:$0xff] }
 0x6f6   :  { %3283 = vmatprep.mubr.msk.f32.mxu0 %vm217_vm2, %v1157_v15 }
 0x6f7   :  { %3284 = vmatmul.mubr.msk.f32.gmra.mxu0 %vm217_vm2, %v1158_v3 }
 0x7b3   :  { %v3282_v44 = vpop.f32.mrf.mxu0 }
 0x7b4   :  { %v1247_v29 = vadd.f32 %v3282_v44, %v2917_v10 }
 0x7b5   :  { %v1241_v51 = vpop.f32.mrf.mxu0 }
 0x7b6   :  { %v1242_v11 = vadd.f32 %v2917_v10, %v1241_v51  ;;  %v1261_v4 = vmax.f32 %v1247_v29, 0.0 }
 0x7b7   :  { %v3285_v12 = vpop.f32.mrf.mxu0 }
 0x7b8   :  { %v1260_v28 = vmax.f32 %v1242_v11, 0.0  ;;  %v1257_v55 = vadd.f32 %v3285_v12, %v2917_v10 }
 0x7b9   :  { %v1251_v14 = vpop.f32.mrf.mxu0 }
 0x7ba   :  { %v1252_v19 = vadd.f32 %v2917_v10, %v1251_v14  ;;  %3302 = vmatprep.mubr.msk.f32.mxu1 %vm1268_vm3, %v1260_v28  ;;  %v1263_v26 = vmax.f32 %v1257_v55, 0.0  ;;  %v4295_v55 = vld [vmem:[%s4873_s1 + $0x28] sm:$0xff] }
 0x7bb   :  { %3303 = vmatmul.mubr.msk.f32.vlgmr.msra.gmra.mxu1 %vm1268_vm3, %v1261_v4  ;;  %v1424_v4 = vsub.s32 0, %v4184_v43 }
 0x7bc   :  { %v1262_v24 = vmax.f32 %v1252_v19, 0.0 }
 0x7bd   :  { %v1425_v19 = vrot.slane %v4295_v55, %v1424_v4 }
 0x7be   :  { %3305 = vmatprep.mubr.msk.f32.mxu1 %vm1268_vm3, %v1262_v24  ;;  %v1432_v24 = vsub.s32 1, %v4184_v43 }
 0x7bf   :  { %3306 = vmatmul.mubr.msk.f32.gmra.mxu1 %vm1268_vm3, %v1263_v26 }
 0x87b   :  { %v3304_v39 = vpop.f32.mrf.mxu1 }
 0x87c   :  { %v1353_v42 = vadd.f32 %v3304_v39, %v1267_v30 }
 0x87d   :  { %v1347_v37 = vpop.f32.mrf.mxu1 }
 0x87e   :  { %v1348_v33 = vadd.f32 %v1347_v37, %v1267_v30  ;;  %v1367_v41 = vadd.f32 %v1353_v42, %v1156_v38  ;;  %v2929_v38 = vld [vmem:[%s4875_s2 + $0x40] sm:$0xff] }
 0x87f   :  { %v3307_v50 = vpop.f32.mrf.mxu1  ;;  %3308 = vmatprep.subr.mxu0 %v2929_v38 }
 0x880   :  { %v1363_v32 = vadd.f32 %v3307_v50, %v1267_v30  ;;  %v1373_v53 = vsel %vm217_vm2, %v1367_v41, 0.0  ;;  %v1366_v48 = vadd.f32 %v1348_v33, %v1155_v20  ;;  %3309 = vmatpush3.msra.mxu0 %v2929_v38  ;;  %v1433_v33 = vrot.slane %v4295_v55, %v1432_v24 }
 0x881   :  { %1374 = vadd.xlane.f32.xlu0 %v1373_v53  ;;  %v1357_v34 = vpop.f32.mrf.mxu1  ;;  %3310 = vmatprep.subr.mxu0 %v2928_v47 }
 0x882   :  { %v1358_v58 = vadd.f32 %v1357_v34, %v1267_v30  ;;  %v1370_v45 = vsel %vm217_vm2, %v1366_v48, 0.0  ;;  %v1369_v61 = vadd.f32 %v1363_v32, %v1158_v3  ;;  %3311 = vmatpush3.msra.mxu0 %v2928_v47  ;;  %v4390_v47 = vld [vmem:[%s4876_s6 + $0x28] sm:$0xff] }
 0x883   :  { %1371 = vadd.xlane.f32.xlu1 %v1370_v45  ;;  %3312 = vmatprep.subr.mxu0 %v2927_v63 }
 0x884   :  { %v1379_v56 = vsel %vm217_vm2, %v1369_v61, 0.0  ;;  %v1368_v18 = vadd.f32 %v1358_v58, %v1157_v15  ;;  %v2926_v15 = vld [vmem:[%s4875_s2 + $0x28] sm:$0xff]  ;;  %3313 = vmatpush3.msra.mxu0 %v2927_v63 }
 0x885   :  { %1380 = vadd.xlane.f32.xlu0 %v1379_v56  ;;  %3314 = vmatprep.subr.mxu0 %v2926_v15 }
 0x886   :  { %v1376_v54 = vsel %vm217_vm2, %v1368_v18, 0.0  ;;  %3315 = vmatpush3.msra.mxu0 %v2926_v15  ;;  %v4397_v15 = vld [vmem:[%s4876_s6 + $0x30] sm:$0xff] }
 0x887   :  { %1377 = vadd.xlane.f32.xlu1 %v1376_v54  ;;  %v2948_v54 = vld [vmem:[%s4875_s2 + $0x48] ss:$0 sm:$0xff] }
 0x90a   :  { %v1375_v52 = vpop.xlane.xlu0 %1374 }
 0x90b   :  { %v1383_v40 = vmul.f32 0.03125, %v1375_v52 }
 0x90c   :  { %v1372_v57 = vpop.xlane.xlu1 %1371 }
 0x90d   :  { %v1387_v5 = vsub.f32 %v1367_v41, %v1383_v40  ;;  %v1382_v35 = vmul.f32 0.03125, %v1372_v57 }
 0x90e   :  { %v1381_v17 = vpop.xlane.xlu0 %1380 }
 0x90f   :  { %v1386_v62 = vsub.f32 %v1366_v48, %v1382_v35  ;;  %v1385_v49 = vmul.f32 0.03125, %v1381_v17  ;;  %v1391_v2 = vmul.f32 %v1387_v5, %v1387_v5  ;;  %v4330_v35 = vld [vmem:[%s4876_s6] sm:$0xff] }
 0x910   :  { %v1378_v6 = vpop.xlane.xlu1 %1377 }
 0x911   :  { %v1389_v8 = vsub.f32 %v1369_v61, %v1385_v49  ;;  %v1384_v0 = vmul.f32 0.03125, %v1378_v6  ;;  %v1397_v59 = vsel %vm217_vm2, %v1391_v2, 0.0  ;;  %v1390_v25 = vmul.f32 %v1386_v62, %v1386_v62 }
 0x912   :  { %1398 = vadd.xlane.f32.xlu0 %v1397_v59 }
 0x913   :  { %v1388_v7 = vsub.f32 %v1368_v18, %v1384_v0  ;;  %v1394_v60 = vsel %vm217_vm2, %v1390_v25, 0.0  ;;  %v1393_v21 = vmul.f32 %v1389_v8, %v1389_v8  ;;  %v4358_v25 = vld [vmem:[%s4876_s6 + $0x8] sm:$0xff] }
 0x914   :  { %1395 = vadd.xlane.f32.xlu1 %v1394_v60  ;;  %v4365_v60 = vld [vmem:[%s4876_s6 + $0x10] sm:$0xff] }
 0x915   :  { %v1403_v16 = vsel %vm217_vm2, %v1393_v21, 0.0  ;;  %v1392_v20 = vmul.f32 %v1388_v7, %v1388_v7 }
 0x916   :  { %1404 = vadd.xlane.f32.xlu0 %v1403_v16  ;;  %v4374_v16 = vld [vmem:[%s4876_s6 + $0x18] sm:$0xff] }
 0x917   :  { %v1400_v31 = vsel %vm217_vm2, %v1392_v20, 0.0 }
 0x918   :  { %1401 = vadd.xlane.f32.xlu1 %v1400_v31  ;;  %v4381_v31 = vld [vmem:[%s4876_s6 + $0x20] sm:$0xff] }
 0x99b   :  { %v1399_v3 = vpop.xlane.xlu0 %1398 }
 0x99c   :  { %v1407_v23 = vmul.f32 0.03125, %v1399_v3 }
 0x99d   :  { %v1396_v22 = vpop.xlane.xlu1 %1395 }
 0x99e   :  { %v1411_v36 = vadd.f32 1e-05, %v1407_v23  ;;  %v1406_v13 = vmul.f32 0.03125, %v1396_v22  ;;  %v4406_v23 = vld [vmem:[%s4876_s6 + $0x38] sm:$0xff] }
 0x99f   :  { %v1405_v10 = vpop.xlane.xlu0 %1404 }
 0x9a0   :  { %3524 = vrsqrt.f32 %v1411_v36  ;;  %v1410_v44 = vadd.f32 1e-05, %v1406_v13  ;;  %v1409_v29 = vmul.f32 0.03125, %v1405_v10  ;;  %v4413_v36 = vld [vmem:[%s4876_s6 + $0x40] sm:$0xff]  ;;  %v4422_v10 = vld [vmem:[%s4876_s6 + $0x48] sm:$0xff] }
 0x9a1   :  { %v1402_v51 = vpop.xlane.xlu1 %1401 }
 0x9a2   :  { %3526 = vrsqrt.f32 %v1410_v44  ;;  %v1413_v11 = vadd.f32 1e-05, %v1409_v29  ;;  %v1408_v12 = vmul.f32 0.03125, %v1402_v51  ;;  %v4429_v29 = vld [vmem:[%s4876_s6 + $0x50] sm:$0xff] }
 0x9a4   :  { %3528 = vrsqrt.f32 %v1413_v11  ;;  %v1412_v28 = vadd.f32 1e-05, %v1408_v12  ;;  %v4438_v11 = vld [vmem:[%s4876_s6 + $0x58] sm:$0xff] }
 0x9a6   :  { %3530 = vrsqrt.f32 %v1412_v28  ;;  %v4445_v28 = vld [vmem:[%s4876_s6 + $0x60] sm:$0xff] }
 0x9ad   :  { %v3525_v14 = vpop.eup %3524 }
 0x9ae   :  { %v1419_v26 = vmul.f32 %v3525_v14, %v1387_v5 }
 0x9af   :  { %v3527_v30 = vpop.eup %3526 }
 0x9b0   :  { %v1418_v39 = vmul.f32 %v3527_v30, %v1386_v62  ;;  %v1427_v37 = vmul.f32 %v1425_v19, %v1419_v26  ;;  %v4461_v30 = vld [vmem:[%s4876_s6 + $0x70] sm:$0xff] }
 0x9b1   :  { %v3529_v42 = vpop.eup %3528 }
 0x9b2   :  { %v1426_v41 = vmul.f32 %v1425_v19, %v1418_v39  ;;  %v1421_v50 = vmul.f32 %v3529_v42, %v1389_v8  ;;  %v4306_v34 = vadd.f32 %v1433_v33, %v1427_v37  ;;  %v4470_v42 = vld [vmem:[%s4876_s6 + $0x78] sm:$0xff] }
 0x9b3   :  { %v3531_v32 = vpop.eup %3530 }
 0x9b4   :  { %v4304_v53 = vadd.f32 %v1433_v33, %v1426_v41  ;;  %v1420_v48 = vmul.f32 %v3531_v32, %v1388_v7  ;;  %v1429_v58 = vmul.f32 %v1425_v19, %v1421_v50 }
 0x9b6   :  { %3316 = vmatprep.mubr.msk.f32.mxu0 %vm217_vm2, %v4304_v53  ;;  %v1428_v45 = vmul.f32 %v1425_v19, %v1420_v48  ;;  %v4314_v56 = vadd.f32 %v1433_v33, %v1429_v58  ;;  %v4454_v19 = vld [vmem:[%s4876_s6 + $0x68] sm:$0xff] }
 0x9b7   :  { %3317 = vmatmul.mubr.msk.f32.vlgmr.msra.gmra.mxu0 %vm217_vm2, %v4306_v34  ;;  %v3637_v48 = vld [vmem:[%s4877_s7 + $0x8] sm:$0xff] }
 0x9b8   :  { %v4312_v61 = vadd.f32 %v1433_v33, %v1428_v45 }
 0x9ba   :  { %3319 = vmatprep.mubr.msk.f32.mxu0 %vm217_vm2, %v4312_v61 }
 0x9bb   :  { %3320 = vmatmul.mubr.msk.f32.gmra.mxu0 %vm217_vm2, %v4314_v56 }
 0xa77   :  { %v3318_v18 = vpop.f32.mrf.mxu0 }
 0xa78   :  { %v4339_v2 = vadd.f32 %v3318_v18, %v2948_v54 }
 0xa79   :  { %v1545_v52 = vpop.f32.mrf.mxu0 }
 0xa7a   :  { %v4323_v40 = vadd.f32 %v2948_v54, %v1545_v52  ;;  %v1565_v7 = vmul.f32 %v4358_v25, %v4339_v2  ;;  %v1569_v63 = vmul.f32 %v4390_v47, %v4339_v2  ;;  %v1573_v44 = vmul.f32 %v4422_v10, %v4339_v2 }
 0xa7b   :  { %v3321_v57 = vpop.f32.mrf.mxu0  ;;  %v1577_v26 = vmul.f32 %v4454_v19, %v4339_v2 }
 0xa7c   :  { %v4325_v5 = vadd.f32 %v3321_v57, %v2948_v54  ;;  %v1564_v17 = vmul.f32 %v4330_v35, %v4323_v40  ;;  %v1568_v38 = vmul.f32 %v4381_v31, %v4323_v40  ;;  %v1572_v13 = vmul.f32 %v4413_v36, %v4323_v40 }
 0xa7d   :  { %v1555_v62 = vpop.f32.mrf.mxu0  ;;  %v1576_v14 = vmul.f32 %v4445_v28, %v4323_v40 }
 0xa7e   :  { %v4334_v49 = vadd.f32 %v2948_v54, %v1555_v62  ;;  %3330 = vmatprep.mubr.msk.f32.mxu0 %vm217_vm2, %v1564_v17  ;;  %1590 = vrot.lane.b32.xlu1 %v4325_v5, %s3654_s12  ;;  %v1567_v20 = vmul.f32 %v4374_v16, %v4325_v5  ;;  %v1571_v22 = vmul.f32 %v4406_v23, %v4325_v5  ;;  %v3638_v54 = vld [vmem:[%s4877_s7] sm:$0xff] }
 0xa7f   :  { %v1575_v12 = vmul.f32 %v4438_v11, %v4325_v5  ;;  %v1579_v37 = vmul.f32 %v4470_v42, %v4325_v5 }
 0xa80   :  { %1588 = vrot.lane.b32.xlu0 %v4334_v49, %s3654_s12  ;;  %v1566_v21 = vmul.f32 %v4365_v60, %v4334_v49  ;;  %v1570_v3 = vmul.f32 %v4397_v15, %v4334_v49  ;;  %v1574_v51 = vmul.f32 %v4429_v29, %v4334_v49  ;;  %v1578_v39 = vmul.f32 %v4461_v30, %v4334_v49 }
 0xa82   :  { %1586 = vrot.lane.b32.xlu1 %v4339_v2, %s3654_s12 }
 0xa86   :  { %1584 = vrot.lane.b32.xlu1 %v4323_v40, %s3654_s12 }
 0xaf0   :  { %v1591_v6 = vpop.permute.xlu1 %1590 }
 0xaf1   :  { %3322 = vmatprep.subr.msk.mxu0 %vm217_vm2, %v1591_v6 }
 0xaf2   :  { %3323 = vmatpush3.xpose.msk.msra.mxu0 %vm217_vm2, %v1591_v6  ;;  %v1589_v8 = vpop.permute.xlu0 %1588 }
 0xaf3   :  { %3324 = vmatprep.subr.msk.mxu0 %vm217_vm2, %v1589_v8 }
 0xaf4   :  { %v1587_v0 = vpop.permute.xlu1 %1586 }
 0xaf6   :  { %3325 = vmatpush3.xpose.msk.msra.mxu0 %vm217_vm2, %v1589_v8 }
 0xaf7   :  { %3326 = vmatprep.subr.msk.mxu0 %vm217_vm2, %v1587_v0 }
 0xaf8   :  { %v1585_v59 = vpop.permute.xlu1 %1584 }
 0xafa   :  { %3327 = vmatpush3.xpose.msk.msra.mxu0 %vm217_vm2, %v1587_v0  ;;  %v3639_v0 = vld [vmem:[%s4877_s7 + $0x10] sm:$0xff] }
 0xafb   :  { %3328 = vmatprep.subr.msk.mxu0 %vm217_vm2, %v1585_v59 }
 0xafe   :  { %3329 = vmatpush3.xpose.msk.msra.mxu0 %vm217_vm2, %v1585_v59 }
 0xb01   :  { %3331 = vmatmul.mubr.msk.f32.vlgmr.msra.gmra.mxu0 %vm217_vm2, %v1565_v7 }
 0xb02   :  { %3333 = vmatprep.mubr.msk.f32.mxu0 %vm217_vm2, %v1566_v21 }
 0xb05   :  { %3334 = vmatmul.mubr.msk.f32.gmra.mxu0 %vm217_vm2, %v1567_v20 }
 0xb06   :  { %3336 = vmatprep.mubr.msk.f32.mxu0 %vm217_vm2, %v1568_v38 }
 0xb09   :  { %3337 = vmatmul.mubr.msk.f32.gmra.mxu0 %vm217_vm2, %v1569_v63  ;;  %v3640_v63 = vld [vmem:[%s4877_s7 + $0x18] sm:$0xff] }
 0xb0a   :  { %3339 = vmatprep.mubr.msk.f32.mxu0 %vm217_vm2, %v1570_v3 }
 0xb0d   :  { %3340 = vmatmul.mubr.msk.f32.gmra.mxu0 %vm217_vm2, %v1571_v22 }
 0xb0e   :  { %3342 = vmatprep.mubr.msk.f32.mxu0 %vm217_vm2, %v1572_v13  ;;  %v3641_v13 = vld [vmem:[%s4877_s7 + $0x20] sm:$0xff] }
 0xb11   :  { %3343 = vmatmul.mubr.msk.f32.gmra.mxu0 %vm217_vm2, %v1573_v44 }
 0xb12   :  { %3345 = vmatprep.mubr.msk.f32.mxu0 %vm217_vm2, %v1574_v51 }
 0xb15   :  { %3346 = vmatmul.mubr.msk.f32.gmra.mxu0 %vm217_vm2, %v1575_v12  ;;  %v3642_v12 = vld [vmem:[%s4877_s7 + $0x28] sm:$0xff] }
 0xb16   :  { %3348 = vmatprep.mubr.msk.f32.mxu0 %vm217_vm2, %v1576_v14 }
 0xb19   :  { %3349 = vmatmul.mubr.msk.f32.gmra.mxu0 %vm217_vm2, %v1577_v26 }
 0xb1a   :  { %3351 = vmatprep.mubr.msk.f32.mxu0 %vm217_vm2, %v1578_v39 }
 0xb1d   :  { %3352 = vmatmul.mubr.msk.f32.gmra.mxu0 %vm217_vm2, %v1579_v37 }
 0xbc1   :  { %v3332_v33 = vpop.f32.mrf.mxu0 }
 0xbc2   :  { %v1794_v41 = vmul.f32 0.35355338, %v3332_v33 }
 0xbc3   :  { %v1714_v50 = vpop.f32.mrf.mxu0 }
 0xbc4   :  { %v1793_v32 = vmul.f32 0.35355338, %v1714_v50  ;;  %v4478_v58 = vadd.f32 %v3637_v48, %v1794_v41  ;;  %v3643_v50 = vld [vmem:[%s4877_s7 + $0x30] sm:$0xff] }
 0xbc5   :  { %v3335_v45 = vpop.f32.mrf.mxu0 }
 0xbc6   :  { %v1828_v18 = vsel %vm217_vm2, %v4478_v58, -inf  ;;  %v4485_v52 = vadd.f32 %v3638_v54, %v1793_v32  ;;  %v1796_v17 = vmul.f32 0.35355338, %v3335_v45 }
 0xbc7   :  { %1829 = vmax.xlane.f32.xlu1 %v1828_v18  ;;  %v1724_v57 = vpop.f32.mrf.mxu0 }
 0xbc8   :  { %v1795_v62 = vmul.f32 0.35355338, %v1724_v57  ;;  %v1825_v6 = vsel %vm217_vm2, %v4485_v52, -inf  ;;  %v4499_v3 = vadd.f32 %v3640_v63, %v1796_v17  ;;  %v3644_v17 = vld [vmem:[%s4877_s7 + $0x38] sm:$0xff] }
 0xbc9   :  { %1826 = vmax.xlane.f32.xlu0 %v1825_v6  ;;  %v3338_v8 = vpop.f32.mrf.mxu0 }
 0xbca   :  { %v4492_v59 = vadd.f32 %v3639_v0, %v1795_v62  ;;  %v1798_v7 = vmul.f32 0.35355338, %v3338_v8  ;;  %v1834_v37 = vsel %vm217_vm2, %v4499_v3, -inf  ;;  %v3645_v8 = vld [vmem:[%s4877_s7 + $0x40] sm:$0xff] }
 0xbcb   :  { %v1734_v21 = vpop.f32.mrf.mxu0 }
 0xbcc   :  { %v1797_v20 = vmul.f32 0.35355338, %v1734_v21  ;;  %v1831_v38 = vsel %vm217_vm2, %v4492_v59, -inf  ;;  %v4509_v14 = vadd.f32 %v3642_v12, %v1798_v7  ;;  %v3647_v12 = vld [vmem:[%s4877_s7 + $0x50] sm:$0xff] }
 0xbcd   :  { %1832 = vmax.xlane.f32.xlu0 %v1831_v38  ;;  %v3341_v22 = vpop.f32.mrf.mxu0 }
 0xbce   :  { %v4504_v44 = vadd.f32 %v3641_v13, %v1797_v20  ;;  %v1800_v26 = vmul.f32 0.35355338, %v3341_v22  ;;  %v1840_v45 = vsel %vm217_vm2, %v4509_v14, -inf  ;;  %v3646_v22 = vld [vmem:[%s4877_s7 + $0x48] sm:$0xff] }
 0xbcf   :  { %v1744_v51 = vpop.f32.mrf.mxu0 }
 0xbd0   :  { %v1799_v39 = vmul.f32 0.35355338, %v1744_v51  ;;  %v1837_v33 = vsel %vm217_vm2, %v4504_v44, -inf  ;;  %v4527_v62 = vadd.f32 %v3644_v17, %v1800_v26 }
 0xbd1   :  { %1835 = vmax.xlane.f32.xlu0 %v1834_v37  ;;  %1838 = vmax.xlane.f32.xlu1 %v1837_v33  ;;  %v3344_v41 = vpop.f32.mrf.mxu0  ;;  %v3648_v37 = vld [vmem:[%s4877_s7 + $0x58] sm:$0xff] }
 0xbd2   :  { %v4518_v32 = vadd.f32 %v3643_v50, %v1799_v39  ;;  %v1802_v18 = vmul.f32 0.35355338, %v3344_v41  ;;  %v1846_v38 = vsel %vm217_vm2, %v4527_v62, -inf }
 0xbd3   :  { %v1754_v48 = vpop.f32.mrf.mxu0 }
 0xbd4   :  { %v1801_v54 = vmul.f32 0.35355338, %v1754_v48  ;;  %v1843_v57 = vsel %vm217_vm2, %v4518_v32, -inf  ;;  %v4541_v13 = vadd.f32 %v3646_v22, %v1802_v18 }
 0xbd5   :  { %1841 = vmax.xlane.f32.xlu0 %v1840_v45  ;;  %1844 = vmax.xlane.f32.xlu1 %v1843_v57  ;;  %v3347_v6 = vpop.f32.mrf.mxu0 }
 0xbd6   :  { %v4532_v0 = vadd.f32 %v3645_v8, %v1801_v54  ;;  %v1804_v7 = vmul.f32 0.35355338, %v3347_v6  ;;  %v1852_v48 = vsel %vm217_vm2, %v4541_v13, -inf  ;;  %v3649_v54 = vld [vmem:[%s4877_s7 + $0x60] sm:$0xff] }
 0xbd7   :  { %v1764_v21 = vpop.f32.mrf.mxu0 }
 0xbd8   :  { %v1803_v20 = vmul.f32 0.35355338, %v1764_v21  ;;  %v1849_v63 = vsel %vm217_vm2, %v4532_v0, -inf  ;;  %v4551_v33 = vadd.f32 %v3648_v37, %v1804_v7 }
 0xbd9   :  { %1847 = vmax.xlane.f32.xlu0 %v1846_v38  ;;  %1850 = vmax.xlane.f32.xlu1 %v1849_v63  ;;  %v3350_v51 = vpop.f32.mrf.mxu0  ;;  %v3651_v63 = vld [vmem:[%s4877_s7 + $0x70] sm:$0xff] }
 0xbda   :  { %v4546_v26 = vadd.f32 %v3647_v12, %v1803_v20  ;;  %v1806_v41 = vmul.f32 0.35355338, %v3350_v51  ;;  %v1858_v6 = vsel %vm217_vm2, %v4551_v33, -inf  ;;  %v3650_v20 = vld [vmem:[%s4877_s7 + $0x68] sm:$0xff] }
 0xbdb   :  { %v1774_v39 = vpop.f32.mrf.mxu0 }
 0xbdc   :  { %v1805_v50 = vmul.f32 0.35355338, %v1774_v39  ;;  %v1855_v45 = vsel %vm217_vm2, %v4546_v26, -inf  ;;  %v4569_v38 = vadd.f32 %v3650_v20, %v1806_v41  ;;  %v3652_v39 = vld [vmem:[%s4877_s7 + $0x78] sm:$0xff] }
 0xbdd   :  { %1853 = vmax.xlane.f32.xlu0 %v1852_v48  ;;  %1856 = vmax.xlane.f32.xlu1 %v1855_v45  ;;  %v3353_v18 = vpop.f32.mrf.mxu0 }
 0xbde   :  { %v4560_v57 = vadd.f32 %v3649_v54, %v1805_v50  ;;  %v1808_v8 = vmul.f32 0.35355338, %v3353_v18  ;;  %v1864_v51 = vsel %vm217_vm2, %v4569_v38, -inf }
 0xbdf   :  { %v1784_v17 = vpop.f32.mrf.mxu0 }
 0xbe0   :  { %v1807_v7 = vmul.f32 0.35355338, %v1784_v17  ;;  %v1861_v21 = vsel %vm217_vm2, %v4560_v57, -inf  ;;  %v4583_v37 = vadd.f32 %v3652_v39, %v1808_v8 }
 0xbe1   :  { %1859 = vmax.xlane.f32.xlu0 %v1858_v6  ;;  %1862 = vmax.xlane.f32.xlu1 %v1861_v21 }
 0xbe2   :  { %v4574_v22 = vadd.f32 %v3651_v63, %v1807_v7  ;;  %v1870_v41 = vsel %vm217_vm2, %v4583_v37, -inf }
 0xbe4   :  { %v1867_v12 = vsel %vm217_vm2, %v4574_v22, -inf }
 0xbe5   :  { %1865 = vmax.xlane.f32.xlu0 %v1864_v51  ;;  %1868 = vmax.xlane.f32.xlu1 %v1867_v12 }
 0xbe9   :  { %1871 = vmax.xlane.f32.xlu0 %v1870_v41 }
 0xbf6   :  { %2007 = vrot.lane.b32.xlu1 %v4325_v5, %s3655_s30 }
 0xbfa   :  { %2003 = vrot.lane.b32.xlu1 %v4339_v2, %s3655_s30 }
 0xbff   :  { %2005 = vrot.lane.b32.xlu0 %v4334_v49, %s3655_s30 }
 0xc03   :  { %2001 = vrot.lane.b32.xlu0 %v4323_v40, %s3655_s30 }
 0xc50   :  { %v1830_v50 = vpop.xlane.xlu1 %1829 }
 0xc51   :  { %v1874_v48 = vsub.f32 %v4478_v58, %v1830_v50 }
 0xc52   :  { %v1827_v45 = vpop.xlane.xlu0 %1826 }
 0xc53   :  { %v1891_v18 = vmul.f32 1.442695, %v1874_v48  ;;  %v1873_v54 = vsub.f32 %v4485_v52, %v1827_v45 }
 0xc55   :  { %3532 = vpow2.f32 %v1891_v18  ;;  %v1889_v17 = vmul.f32 1.442695, %v1873_v54 }
 0xc56   :  { %v1833_v6 = vpop.xlane.xlu0 %1832 }
 0xc57   :  { %3534 = vpow2.f32 %v1889_v17  ;;  %v1875_v5 = vsub.f32 %v4492_v59, %v1833_v6 }
 0xc59   :  { %v1893_v2 = vmul.f32 1.442695, %v1875_v5 }
 0xc5a   :  { %v1836_v8 = vpop.xlane.xlu0 %1835  ;;  %v1839_v7 = vpop.xlane.xlu1 %1838 }
 0xc5b   :  { %3536 = vpow2.f32 %v1893_v2  ;;  %v1876_v49 = vsub.f32 %v4499_v3, %v1836_v8  ;;  %v1877_v40 = vsub.f32 %v4504_v44, %v1839_v7 }
 0xc5d   :  { %v1895_v21 = vmul.f32 1.442695, %v1876_v49  ;;  %v1897_v58 = vmul.f32 1.442695, %v1877_v40 }
 0xc5e   :  { %v1842_v20 = vpop.xlane.xlu0 %1841  ;;  %v1845_v63 = vpop.xlane.xlu1 %1844 }
 0xc5f   :  { %3538 = vpow2.f32 %v1895_v21  ;;  %v1878_v52 = vsub.f32 %v4509_v14, %v1842_v20  ;;  %v1879_v51 = vsub.f32 %v4518_v32, %v1845_v63 }
 0xc60   :  { %3540 = vpow2.f32 %v1897_v58 }
 0xc61   :  { %v1899_v12 = vmul.f32 1.442695, %v1878_v52  ;;  %v1901_v59 = vmul.f32 1.442695, %v1879_v51 }
 0xc62   :  { %v4602_v39 = vpop.eup %3532  ;;  %v1848_v41 = vpop.xlane.xlu0 %1847 }
 0xc63   :  { %v1851_v50 = vpop.xlane.xlu1 %1850  ;;  %3542 = vpow2.f32 %v1899_v12  ;;  %v1880_v3 = vsub.f32 %v4527_v62, %v1848_v41  ;;  %v1924_v48 = vsel %vm217_vm2, %v4602_v39, 0.0 }
 0xc64   :  { %v1881_v44 = vsub.f32 %v4532_v0, %v1851_v50  ;;  %v4608_v45 = vpop.eup %3534  ;;  %3544 = vpow2.f32 %v1901_v59  ;;  %1925 = vadd.xlane.f32.xlu0 %v1924_v48 }
 0xc65   :  { %v1903_v14 = vmul.f32 1.442695, %v1880_v3  ;;  %v1921_v18 = vsel %vm217_vm2, %v4608_v45, 0.0 }
 0xc66   :  { %v1905_v32 = vmul.f32 1.442695, %v1881_v44  ;;  %v1854_v54 = vpop.xlane.xlu0 %1853  ;;  %1922 = vadd.xlane.f32.xlu1 %v1921_v18 }
 0xc67   :  { %v1857_v17 = vpop.xlane.xlu1 %1856  ;;  %3546 = vpow2.f32 %v1903_v14  ;;  %v1882_v62 = vsub.f32 %v4541_v13, %v1854_v54 }
 0xc68   :  { %v1883_v0 = vsub.f32 %v4546_v26, %v1857_v17  ;;  %v4614_v6 = vpop.eup %3536  ;;  %3548 = vpow2.f32 %v1905_v32 }
 0xc69   :  { %v1907_v5 = vmul.f32 1.442695, %v1882_v62  ;;  %v1927_v8 = vsel %vm217_vm2, %v4614_v6, 0.0 }
 0xc6a   :  { %v1909_v2 = vmul.f32 1.442695, %v1883_v0  ;;  %v1860_v7 = vpop.xlane.xlu0 %1859  ;;  %1928 = vadd.xlane.f32.xlu1 %v1927_v8 }
 0xc6b   :  { %v1863_v49 = vpop.xlane.xlu1 %1862  ;;  %3550 = vpow2.f32 %v1907_v5  ;;  %v1884_v40 = vsub.f32 %v4551_v33, %v1860_v7 }
 0xc6c   :  { %v1885_v21 = vsub.f32 %v4560_v57, %v1863_v49  ;;  %v4620_v58 = vpop.eup %3538  ;;  %3552 = vpow2.f32 %v1909_v2 }
 0xc6d   :  { %v4622_v13 = vpop.eup %3540  ;;  %v1911_v26 = vmul.f32 1.442695, %v1884_v40  ;;  %v1930_v63 = vsel %vm217_vm2, %v4620_v58, 0.0 }
 0xc6e   :  { %v1913_v20 = vmul.f32 1.442695, %v1885_v21  ;;  %v1866_v52 = vpop.xlane.xlu0 %1865  ;;  %1931 = vadd.xlane.f32.xlu0 %v1930_v63  ;;  %v1933_v51 = vsel %vm217_vm2, %v4622_v13, 0.0 }
 0xc6f   :  { %v1869_v12 = vpop.xlane.xlu1 %1868  ;;  %3554 = vpow2.f32 %v1911_v26  ;;  %v1886_v33 = vsub.f32 %v4569_v38, %v1866_v52  ;;  %1934 = vadd.xlane.f32.xlu1 %v1933_v51 }
 0xc70   :  { %v1887_v57 = vsub.f32 %v4574_v22, %v1869_v12  ;;  %v4630_v59 = vpop.eup %3542  ;;  %3556 = vpow2.f32 %v1913_v20 }
 0xc71   :  { %v4632_v41 = vpop.eup %3544  ;;  %v1915_v50 = vmul.f32 1.442695, %v1886_v33  ;;  %v1936_v44 = vsel %vm217_vm2, %v4630_v59, 0.0 }
 0xc72   :  { %v1917_v3 = vmul.f32 1.442695, %v1887_v57  ;;  %1937 = vadd.xlane.f32.xlu0 %v1936_v44  ;;  %v1872_v48 = vpop.xlane.xlu0 %1871  ;;  %v1939_v14 = vsel %vm217_vm2, %v4632_v41, 0.0 }
 0xc73   :  { %v2008_v32 = vpop.permute.xlu1 %2007  ;;  %3558 = vpow2.f32 %v1915_v50  ;;  %v1888_v38 = vsub.f32 %v4583_v37, %v1872_v48  ;;  %1940 = vadd.xlane.f32.xlu1 %v1939_v14 }
 0xc74   :  { %3354 = vmatprep.subr.mxu1 %v2008_v32  ;;  %v4639_v22 = vpop.eup %3546  ;;  %3560 = vpow2.f32 %v1917_v3 }
 0xc75   :  { %3355 = vmatpush3.msra.mxu1 %v2008_v32  ;;  %v4641_v18 = vpop.eup %3548  ;;  %v1919_v54 = vmul.f32 1.442695, %v1888_v38  ;;  %v1942_v17 = vsel %vm217_vm2, %v4639_v22, 0.0 }
 0xc76   :  { %1943 = vadd.xlane.f32.xlu0 %v1942_v17  ;;  %v2006_v62 = vpop.permute.xlu0 %2005  ;;  %v1945_v0 = vsel %vm217_vm2, %v4641_v18, 0.0 }
 0xc77   :  { %3562 = vpow2.f32 %v1919_v54  ;;  %1946 = vadd.xlane.f32.xlu1 %v1945_v0  ;;  %3356 = vmatprep.subr.mxu1 %v2006_v62  ;;  %v2004_v5 = vpop.permute.xlu1 %2003 }
 0xc78   :  { %v4647_v37 = vpop.eup %3550  ;;  %3357 = vmatpush3.msra.mxu1 %v2006_v62 }
 0xc79   :  { %v4649_v2 = vpop.eup %3552  ;;  %3358 = vmatprep.subr.mxu1 %v2004_v5  ;;  %v1948_v8 = vsel %vm217_vm2, %v4647_v37, 0.0 }
 0xc7a   :  { %1949 = vadd.xlane.f32.xlu0 %v1948_v8  ;;  %v2002_v7 = vpop.permute.xlu0 %2001  ;;  %v1951_v49 = vsel %vm217_vm2, %v4649_v2, 0.0  ;;  %3359 = vmatpush3.msra.mxu1 %v2004_v5 }
 0xc7b   :  { %1952 = vadd.xlane.f32.xlu1 %v1951_v49  ;;  %3360 = vmatprep.subr.mxu1 %v2002_v7 }
 0xc7c   :  { %v4655_v40 = vpop.eup %3554  ;;  %3361 = vmatpush3.msra.mxu1 %v2002_v7 }
 0xc7d   :  { %v4657_v21 = vpop.eup %3556  ;;  %v1954_v26 = vsel %vm217_vm2, %v4655_v40, 0.0 }
 0xc7e   :  { %1955 = vadd.xlane.f32.xlu0 %v1954_v26  ;;  %v1957_v20 = vsel %vm217_vm2, %v4657_v21, 0.0 }
 0xc7f   :  { %1958 = vadd.xlane.f32.xlu1 %v1957_v20 }
 0xc80   :  { %v4663_v63 = vpop.eup %3558 }
 0xc81   :  { %v4665_v52 = vpop.eup %3560  ;;  %v1960_v51 = vsel %vm217_vm2, %v4663_v63, 0.0 }
 0xc82   :  { %1961 = vadd.xlane.f32.xlu0 %v1960_v51  ;;  %v1963_v12 = vsel %vm217_vm2, %v4665_v52, 0.0 }
 0xc83   :  { %1964 = vadd.xlane.f32.xlu1 %v1963_v12 }
 0xc84   :  { %v4671_v33 = vpop.eup %3562 }
 0xc85   :  { %v1966_v57 = vsel %vm217_vm2, %v4671_v33, 0.0 }
 0xc86   :  { %1967 = vadd.xlane.f32.xlu0 %v1966_v57 }
 0xced   :  { %v1926_v50 = vpop.xlane.xlu0 %1925 }
 0xcee   :  { %3564 = vrcp.f32 %v1926_v50 }
 0xcef   :  { %v1923_v3 = vpop.xlane.xlu1 %1922 }
 0xcf0   :  { %3566 = vrcp.f32 %v1923_v3 }
 0xcf3   :  { %v1929_v44 = vpop.xlane.xlu1 %1928 }
 0xcf4   :  { %3568 = vrcp.f32 %v1929_v44 }
 0xcf7   :  { %v1932_v48 = vpop.xlane.xlu0 %1931 }
 0xcf8   :  { %3570 = vrcp.f32 %v1932_v48  ;;  %v1935_v14 = vpop.xlane.xlu1 %1934 }
 0xcf9   :  { %3572 = vrcp.f32 %v1935_v14 }
 0xcfb   :  { %v1938_v32 = vpop.xlane.xlu0 %1937  ;;  %v3565_v38 = vpop.eup %3564 }
 0xcfc   :  { %3574 = vrcp.f32 %v1938_v32  ;;  %v1941_v54 = vpop.xlane.xlu1 %1940  ;;  %v1986_v0 = vmul.f32 %v3565_v38, %v4602_v39 }
 0xcfd   :  { %v3567_v17 = vpop.eup %3566  ;;  %3576 = vrcp.f32 %v1941_v54 }
 0xcfe   :  { %v1985_v62 = vmul.f32 %v3567_v17, %v4608_v45 }
 0xcff   :  { %v1944_v5 = vpop.xlane.xlu0 %1943 }
 0xd00   :  { %3578 = vrcp.f32 %v1944_v5  ;;  %v1947_v8 = vpop.xlane.xlu1 %1946  ;;  %3362 = vmatprep.mubr.msk.f32.mxu1 %vm217_vm2, %v1985_v62 }
 0xd01   :  { %v3569_v7 = vpop.eup %3568  ;;  %3580 = vrcp.f32 %v1947_v8  ;;  %3363 = vmatmul.mubr.msk.f32.vlgmr.msra.gmra.mxu1 %vm217_vm2, %v1986_v0 }
 0xd02   :  { %v1987_v49 = vmul.f32 %v3569_v7, %v4614_v6 }
 0xd03   :  { %v1950_v26 = vpop.xlane.xlu0 %1949 }
 0xd04   :  { %3582 = vrcp.f32 %v1950_v26  ;;  %v1953_v20 = vpop.xlane.xlu1 %1952  ;;  %3365 = vmatprep.mubr.msk.f32.mxu1 %vm217_vm2, %v1987_v49 }
 0xd05   :  { %v3571_v51 = vpop.eup %3570  ;;  %3584 = vrcp.f32 %v1953_v20 }
 0xd06   :  { %v3573_v45 = vpop.eup %3572  ;;  %v1988_v39 = vmul.f32 %v3571_v51, %v4620_v58 }
 0xd07   :  { %v1956_v12 = vpop.xlane.xlu0 %1955  ;;  %v1989_v57 = vmul.f32 %v3573_v45, %v4622_v13 }
 0xd08   :  { %3586 = vrcp.f32 %v1956_v12  ;;  %v1959_v50 = vpop.xlane.xlu1 %1958  ;;  %3366 = vmatmul.mubr.msk.f32.gmra.mxu1 %vm217_vm2, %v1988_v39 }
 0xd09   :  { %v3575_v3 = vpop.eup %3574  ;;  %3588 = vrcp.f32 %v1959_v50  ;;  %3368 = vmatprep.mubr.msk.f32.mxu1 %vm217_vm2, %v1989_v57 }
 0xd0a   :  { %v3577_v6 = vpop.eup %3576  ;;  %v1990_v44 = vmul.f32 %v3575_v3, %v4630_v59 }
 0xd0b   :  { %v1962_v48 = vpop.xlane.xlu0 %1961  ;;  %v1991_v14 = vmul.f32 %v3577_v6, %v4632_v41 }
 0xd0c   :  { %3590 = vrcp.f32 %v1962_v48  ;;  %v1965_v32 = vpop.xlane.xlu1 %1964  ;;  %3369 = vmatmul.mubr.msk.f32.gmra.mxu1 %vm217_vm2, %v1990_v44 }
 0xd0d   :  { %v3579_v58 = vpop.eup %3578  ;;  %3592 = vrcp.f32 %v1965_v32  ;;  %3371 = vmatprep.mubr.msk.f32.mxu1 %vm217_vm2, %v1991_v14 }
 0xd0e   :  { %v3581_v13 = vpop.eup %3580  ;;  %v1992_v38 = vmul.f32 %v3579_v58, %v4639_v22 }
 0xd0f   :  { %v1968_v54 = vpop.xlane.xlu0 %1967  ;;  %v1993_v17 = vmul.f32 %v3581_v13, %v4641_v18 }
 0xd10   :  { %3594 = vrcp.f32 %v1968_v54  ;;  %3372 = vmatmul.mubr.msk.f32.gmra.mxu1 %vm217_vm2, %v1992_v38 }
 0xd11   :  { %v3583_v59 = vpop.eup %3582  ;;  %3374 = vmatprep.mubr.msk.f32.mxu1 %vm217_vm2, %v1993_v17 }
 0xd12   :  { %v3585_v41 = vpop.eup %3584  ;;  %v1994_v62 = vmul.f32 %v3583_v59, %v4647_v37 }
 0xd13   :  { %v1995_v0 = vmul.f32 %v3585_v41, %v4649_v2 }
 0xd14   :  { %3375 = vmatmul.mubr.msk.f32.gmra.mxu1 %vm217_vm2, %v1994_v62 }
 0xd15   :  { %v3587_v5 = vpop.eup %3586  ;;  %3377 = vmatprep.mubr.msk.f32.mxu1 %vm217_vm2, %v1995_v0 }
 0xd16   :  { %v3589_v22 = vpop.eup %3588  ;;  %v1996_v8 = vmul.f32 %v3587_v5, %v4655_v40  ;;  %v2934_v40 = vld [vmem:[%s4878_s3 + $0x78] sm:$0xff] }
 0xd17   :  { %v1997_v18 = vmul.f32 %v3589_v22, %v4657_v21  ;;  %3386 = vmatprep.subr.mxu1 %v2934_v40  ;;  %v2933_v21 = vld [vmem:[%s4878_s3 + $0x70] sm:$0xff] }
 0xd18   :  { %3378 = vmatmul.mubr.msk.f32.gmra.mxu1 %vm217_vm2, %v1996_v8 }
 0xd19   :  { %v3591_v7 = vpop.eup %3590  ;;  %3380 = vmatprep.mubr.msk.f32.mxu1 %vm217_vm2, %v1997_v18  ;;  %3387 = vmatpush3.msra.mxu1 %v2934_v40 }
 0xd1a   :  { %v3593_v49 = vpop.eup %3592  ;;  %v1998_v37 = vmul.f32 %v3591_v7, %v4663_v63  ;;  %3388 = vmatprep.subr.mxu1 %v2933_v21  ;;  %v2932_v63 = vld [vmem:[%s4878_s3 + $0x68] sm:$0xff] }
 0xd1b   :  { %v1999_v2 = vmul.f32 %v3593_v49, %v4665_v52  ;;  %3389 = vmatpush3.msra.mxu1 %v2933_v21  ;;  %v2931_v52 = vld [vmem:[%s4878_s3 + $0x60] sm:$0xff] }
 0xd1c   :  { %3381 = vmatmul.mubr.msk.f32.gmra.mxu1 %vm217_vm2, %v1998_v37  ;;  %3390 = vmatprep.subr.mxu1 %v2932_v63 }
 0xd1d   :  { %v3595_v26 = vpop.eup %3594  ;;  %3383 = vmatprep.mubr.msk.f32.mxu1 %vm217_vm2, %v1999_v2  ;;  %3391 = vmatpush3.msra.mxu1 %v2932_v63 }
 0xd1e   :  { %v2000_v20 = vmul.f32 %v3595_v26, %v4671_v33  ;;  %3392 = vmatprep.subr.mxu1 %v2931_v52 }
 0xd1f   :  { %3393 = vmatpush3.msra.mxu1 %v2931_v52 }
 0xd20   :  { %3384 = vmatmul.mubr.msk.f32.gmra.mxu1 %vm217_vm2, %v2000_v20 }
 0xdc1   :  { %v3364_v33 = vpop.f32.mrf.mxu1 }
 0xdc2   :  { %v2207_v54 = vmul.f32 %v4358_v25, %v3364_v33 }
 0xdc3   :  { %v2127_v51 = vpop.f32.mrf.mxu1 }
 0xdc4   :  { %v2206_v13 = vmul.f32 %v4330_v35, %v2127_v51 }
 0xdc8   :  { %v3367_v45 = vpop.f32.mrf.mxu1 }
 0xdc9   :  { %v2209_v25 = vmul.f32 %v4374_v16, %v3367_v45 }
 0xdca   :  { %v2137_v39 = vpop.f32.mrf.mxu1 }
 0xdcc   :  { %v3370_v12 = vpop.f32.mrf.mxu1 }
 0xdcd   :  { %v2211_v32 = vmul.f32 %v4390_v47, %v3370_v12  ;;  %v2208_v47 = vmul.f32 %v4365_v60, %v2137_v39 }
 0xdce   :  { %v2147_v57 = vpop.f32.mrf.mxu1 }
 0xdcf   :  { %v2210_v14 = vmul.f32 %v4381_v31, %v2147_v57  ;;  %v2223_v0 = vadd.f32 %v2211_v32, %v2207_v54 }
 0xdd0   :  { %v3373_v50 = vpop.f32.mrf.mxu1 }
 0xdd1   :  { %v2222_v41 = vadd.f32 %v2210_v14, %v2206_v13  ;;  %v2213_v5 = vmul.f32 %v4406_v23, %v3373_v50 }
 0xdd2   :  { %v2157_v3 = vpop.f32.mrf.mxu1 }
 0xdd3   :  { %v2212_v62 = vmul.f32 %v4397_v15, %v2157_v3  ;;  %v2225_v37 = vadd.f32 %v2213_v5, %v2209_v25  ;;  %v2942_v25 = vld [vmem:[%s4878_s3 + $0xb8] sm:$0xff] }
 0xdd4   :  { %v3376_v6 = vpop.f32.mrf.mxu1  ;;  %3414 = vmatprep.subr.mxu1 %v2942_v25 }
 0xdd5   :  { %v2215_v17 = vmul.f32 %v4422_v10, %v3376_v6  ;;  %v2224_v15 = vadd.f32 %v2212_v62, %v2208_v47 }
 0xdd6   :  { %v2167_v44 = vpop.f32.mrf.mxu1 }
 0xdd7   :  { %v2214_v38 = vmul.f32 %v4413_v36, %v2167_v44  ;;  %v2227_v10 = vadd.f32 %v2223_v0, %v2215_v17 }
 0xdd8   :  { %v3379_v48 = vpop.f32.mrf.mxu1 }
 0xdd9   :  { %v2226_v8 = vadd.f32 %v2222_v41, %v2214_v38  ;;  %v2217_v18 = vmul.f32 %v4438_v11, %v3379_v48  ;;  %v2236_v11 = vsub.s32 2, %v4184_v43 }
 0xdda   :  { %v2177_v58 = vpop.f32.mrf.mxu1 }
 0xddb   :  { %v2216_v35 = vmul.f32 %v4429_v29, %v2177_v58  ;;  %v2229_v29 = vadd.f32 %v2225_v37, %v2217_v18  ;;  %v2237_v20 = vrot.slane %v4295_v55, %v2236_v11  ;;  %v2940_v18 = vld [vmem:[%s4878_s3 + $0xa8] sm:$0xff] }
 0xddc   :  { %v3382_v59 = vpop.f32.mrf.mxu1 }
 0xddd   :  { %v2219_v31 = vmul.f32 %v4454_v19, %v3382_v59  ;;  %v2228_v26 = vadd.f32 %v2224_v15, %v2216_v35  ;;  %v2944_v35 = vld [vmem:[%s4879_s4 + $0x30] sm:$0xff] }
 0xdde   :  { %v2187_v22 = vpop.f32.mrf.mxu1 }
 0xddf   :  { %v2218_v36 = vmul.f32 %v4445_v28, %v2187_v22  ;;  %v2231_v23 = vadd.f32 %v2227_v10, %v2219_v31  ;;  %v2941_v10 = vld [vmem:[%s4878_s3 + $0xb0] sm:$0xff] }
 0xde0   :  { %v3385_v7 = vpop.f32.mrf.mxu1 }
 0xde1   :  { %v2230_v49 = vadd.f32 %v2226_v8, %v2218_v36  ;;  %v2221_v19 = vmul.f32 %v4470_v42, %v3385_v7  ;;  %v2945_v8 = vld [vmem:[%s4879_s4 + $0x38] sm:$0xff]  ;;  %v2943_v36 = vld [vmem:[%s4879_s4 + $0x28] sm:$0xff]  ;;  %v2939_v7 = vld [vmem:[%s4878_s3 + $0xa0] sm:$0xff] }
 0xde2   :  { %v2197_v2 = vpop.f32.mrf.mxu1 }
 0xde3   :  { %v2220_v60 = vmul.f32 %v4461_v30, %v2197_v2  ;;  %3394 = vmatprep.mubr.msk.f32.mxu1 %vm217_vm2, %v2230_v49  ;;  %v2233_v28 = vadd.f32 %v2229_v29, %v2221_v19 }
 0xde4   :  { %3395 = vmatmul.mubr.msk.f32.vlgmr.msra.gmra.mxu1 %vm217_vm2, %v2231_v23 }
 0xde5   :  { %v2232_v16 = vadd.f32 %v2228_v26, %v2220_v60  ;;  %3415 = vmatpush3.msra.mxu1 %v2942_v25 }
 0xde6   :  { %3416 = vmatprep.subr.mxu1 %v2941_v10 }
 0xde7   :  { %3397 = vmatprep.mubr.msk.f32.mxu1 %vm217_vm2, %v2232_v16  ;;  %3417 = vmatpush3.msra.mxu1 %v2941_v10 }
 0xde8   :  { %3398 = vmatmul.mubr.msk.f32.gmra.mxu1 %vm217_vm2, %v2233_v28  ;;  %3418 = vmatprep.subr.mxu1 %v2940_v18 }
 0xde9   :  { %3419 = vmatpush3.msra.mxu1 %v2940_v18 }
 0xdea   :  { %3420 = vmatprep.subr.mxu1 %v2939_v7 }
 0xdeb   :  { %3421 = vmatpush3.msra.mxu1 %v2939_v7 }
 0xea4   :  { %v3396_v42 = vpop.f32.mrf.mxu1 }
 0xea5   :  { %v2322_v40 = vadd.f32 %v3396_v42, %v2237_v20  ;;  %v4780_v42 = vld [vmem:[%s4873_s1 + $0x28] sm:$0xff] }
 0xea6   :  { %v2316_v21 = vpop.f32.mrf.mxu1 }
 0xea7   :  { %v2336_v30 = vadd.f32 %v2322_v40, %v4306_v34  ;;  %v2317_v63 = vadd.f32 %v2316_v21, %v2237_v20  ;;  %v2394_v40 = vrot.slane %v4780_v42, %v987_v9 }
 0xea8   :  { %v3399_v52 = vpop.f32.mrf.mxu1 }
 0xea9   :  { %v2332_v33 = vadd.f32 %v3399_v52, %v2237_v20  ;;  %v2342_v51 = vsel %vm217_vm2, %v2336_v30, 0.0  ;;  %v2335_v45 = vadd.f32 %v2317_v63, %v4304_v53  ;;  %v2946_v53 = vld [vmem:[%s4879_s4 + $0x40] sm:$0xff] }
 0xeaa   :  { %2343 = vadd.xlane.f32.xlu0 %v2342_v51  ;;  %v2326_v39 = vpop.f32.mrf.mxu1  ;;  %3400 = vmatprep.subr.mxu0 %v2946_v53 }
 0xeab   :  { %v2338_v12 = vadd.f32 %v2332_v33, %v4314_v56  ;;  %v2327_v57 = vadd.f32 %v2326_v39, %v2237_v20  ;;  %v2339_v50 = vsel %vm217_vm2, %v2335_v45, 0.0  ;;  %3401 = vmatpush3.msra.mxu0 %v2946_v53  ;;  %v2402_v33 = vrot.slane %v4780_v42, %v1266_v27  ;;  %v2938_v27 = vld [vmem:[%s4878_s3 + $0x98] sm:$0xff] }
 0xeac   :  { %2340 = vadd.xlane.f32.xlu1 %v2339_v50  ;;  %3402 = vmatprep.subr.mxu0 %v2945_v8 }
 0xead   :  { %v2348_v55 = vsel %vm217_vm2, %v2338_v12, 0.0  ;;  %v2337_v3 = vadd.f32 %v2327_v57, %v4312_v61  ;;  %3403 = vmatpush3.msra.mxu0 %v2945_v8  ;;  %3422 = vmatprep.subr.mxu1 %v2938_v27 }
 0xeae   :  { %2349 = vadd.xlane.f32.xlu0 %v2348_v55  ;;  %3404 = vmatprep.subr.mxu0 %v2944_v35 }
 0xeaf   :  { %v2345_v34 = vsel %vm217_vm2, %v2337_v3, 0.0  ;;  %3405 = vmatpush3.msra.mxu0 %v2944_v35  ;;  %3423 = vmatpush3.msra.mxu1 %v2938_v27 }
 0xeb0   :  { %2346 = vadd.xlane.f32.xlu1 %v2345_v34  ;;  %3406 = vmatprep.subr.mxu0 %v2943_v36 }
 0xeb1   :  { %3407 = vmatpush3.msra.mxu0 %v2943_v36 }
 0xf33   :  { %v2344_v6 = vpop.xlane.xlu0 %2343 }
 0xf34   :  { %v2352_v56 = vmul.f32 0.03125, %v2344_v6  ;;  %v2937_v6 = vld [vmem:[%s4878_s3 + $0x90] sm:$0xff] }
 0xf35   :  { %v2341_v44 = vpop.xlane.xlu1 %2340  ;;  %3424 = vmatprep.subr.mxu1 %v2937_v6 }
 0xf36   :  { %v2356_v48 = vsub.f32 %v2336_v30, %v2352_v56  ;;  %v2351_v14 = vmul.f32 0.03125, %v2341_v44  ;;  %3425 = vmatpush3.msra.mxu1 %v2937_v6  ;;  %v2936_v56 = vld [vmem:[%s4878_s3 + $0x88] sm:$0xff]  ;;  %v2935_v44 = vld [vmem:[%s4878_s3 + $0x80] sm:$0xff] }
 0xf37   :  { %v2350_v32 = vpop.xlane.xlu0 %2349  ;;  %3426 = vmatprep.subr.mxu1 %v2936_v56 }
 0xf38   :  { %v2355_v58 = vsub.f32 %v2335_v45, %v2351_v14  ;;  %v2354_v13 = vmul.f32 0.03125, %v2350_v32  ;;  %v2360_v38 = vmul.f32 %v2356_v48, %v2356_v48  ;;  %3427 = vmatpush3.msra.mxu1 %v2936_v56 }
 0xf39   :  { %v2347_v61 = vpop.xlane.xlu1 %2346  ;;  %3428 = vmatprep.subr.mxu1 %v2935_v44 }
 0xf3a   :  { %v2358_v54 = vsub.f32 %v2338_v12, %v2354_v13  ;;  %v2353_v17 = vmul.f32 0.03125, %v2347_v61  ;;  %v2366_v59 = vsel %vm217_vm2, %v2360_v38, 0.0  ;;  %v2359_v41 = vmul.f32 %v2355_v58, %v2355_v58  ;;  %3429 = vmatpush3.msra.mxu1 %v2935_v44 }
 0xf3b   :  { %2367 = vadd.xlane.f32.xlu0 %v2366_v59 }
 0xf3c   :  { %v2357_v62 = vsub.f32 %v2337_v3, %v2353_v17  ;;  %v2363_v0 = vsel %vm217_vm2, %v2359_v41, 0.0  ;;  %v2362_v5 = vmul.f32 %v2358_v54, %v2358_v54 }
 0xf3d   :  { %2364 = vadd.xlane.f32.xlu1 %v2363_v0 }
 0xf3e   :  { %v2372_v31 = vsel %vm217_vm2, %v2362_v5, 0.0  ;;  %v2361_v22 = vmul.f32 %v2357_v62, %v2357_v62  ;;  %v2514_v5 = vsub.s32 3, %v4184_v43  ;;  %v3002_v43 = vld [vmem:[%s4880_s5 + $0x20] ss:$0 sm:$0xff] }
 0xf3f   :  { %2373 = vadd.xlane.f32.xlu0 %v2372_v31 }
 0xf40   :  { %v2369_v47 = vsel %vm217_vm2, %v2361_v22, 0.0  ;;  %v2515_v31 = vrot.slane %v4780_v42, %v2514_v5 }
 0xf41   :  { %2370 = vadd.xlane.f32.xlu1 %v2369_v47 }
 0xfc4   :  { %v2368_v15 = vpop.xlane.xlu0 %2367 }
 0xfc5   :  { %v2376_v49 = vmul.f32 0.03125, %v2368_v15 }
 0xfc6   :  { %v2365_v37 = vpop.xlane.xlu1 %2364 }
 0xfc7   :  { %v2380_v23 = vadd.f32 1e-05, %v2376_v49  ;;  %v2375_v19 = vmul.f32 0.03125, %v2365_v37 }
 0xfc8   :  { %v2374_v2 = vpop.xlane.xlu0 %2373 }
 0xfc9   :  { %3596 = vrsqrt.f32 %v2380_v23  ;;  %v2379_v26 = vadd.f32 1e-05, %v2375_v19  ;;  %v2378_v60 = vmul.f32 0.03125, %v2374_v2 }
 0xfca   :  { %v2371_v29 = vpop.xlane.xlu1 %2370 }
 0xfcb   :  { %3598 = vrsqrt.f32 %v2379_v26  ;;  %v2382_v16 = vadd.f32 1e-05, %v2378_v60  ;;  %v2377_v28 = vmul.f32 0.03125, %v2371_v29 }
 0xfcd   :  { %3600 = vrsqrt.f32 %v2382_v16  ;;  %v2381_v11 = vadd.f32 1e-05, %v2377_v28 }
 0xfcf   :  { %3602 = vrsqrt.f32 %v2381_v11 }
 0xfd6   :  { %v3597_v20 = vpop.eup %3596 }
 0xfd7   :  { %v2388_v21 = vmul.f32 %v3597_v20, %v2356_v48  ;;  %v2993_v48 = vld [vmem:[%s4879_s4 + $0x48] ss:$0 sm:$0xff] }
 0xfd8   :  { %v3599_v30 = vpop.eup %3598 }
 0xfd9   :  { %v2387_v63 = vmul.f32 %v3599_v30, %v2355_v58  ;;  %v2396_v51 = vmul.f32 %v2394_v40, %v2388_v21 }
 0xfda   :  { %v3601_v52 = vpop.eup %3600 }
 0xfdb   :  { %v2395_v45 = vmul.f32 %v2394_v40, %v2387_v63  ;;  %v2390_v39 = vmul.f32 %v3601_v52, %v2358_v54  ;;  %v2404_v55 = vadd.f32 %v2402_v33, %v2396_v51 }
 0xfdc   :  { %v3603_v12 = vpop.eup %3602 }
 0xfdd   :  { %v2403_v57 = vadd.f32 %v2402_v33, %v2395_v45  ;;  %v2389_v50 = vmul.f32 %v3603_v12, %v2357_v62  ;;  %v2398_v3 = vmul.f32 %v2394_v40, %v2390_v39 }
 0xfdf   :  { %3408 = vmatprep.mubr.msk.f32.mxu0 %vm217_vm2, %v2403_v57  ;;  %v2397_v34 = vmul.f32 %v2394_v40, %v2389_v50  ;;  %v2406_v53 = vadd.f32 %v2402_v33, %v2398_v3 }
 0xfe0   :  { %3409 = vmatmul.mubr.msk.f32.vlgmr.msra.gmra.mxu0 %vm217_vm2, %v2404_v55 }
 0xfe1   :  { %v2405_v9 = vadd.f32 %v2402_v33, %v2397_v34 }
 0xfe3   :  { %3411 = vmatprep.mubr.msk.f32.mxu0 %vm217_vm2, %v2405_v9 }
 0xfe4   :  { %3412 = vmatmul.mubr.msk.f32.gmra.mxu0 %vm217_vm2, %v2406_v53 }
0x10a0   :  { %v3410_v14 = vpop.f32.mrf.mxu0 }
0x10a1   :  { %v2495_v32 = vadd.f32 %v3410_v14, %v2993_v48 }
0x10a2   :  { %v2489_v58 = vpop.f32.mrf.mxu0 }
0x10a3   :  { %v2490_v13 = vadd.f32 %v2993_v48, %v2489_v58  ;;  %v2509_v54 = vmax.f32 %v2495_v32, 0.0 }
0x10a4   :  { %v3413_v38 = vpop.f32.mrf.mxu0 }
0x10a5   :  { %v2508_v61 = vmax.f32 %v2490_v13, 0.0  ;;  %v2505_v17 = vadd.f32 %v3413_v38, %v2993_v48  ;;  %v2672_v38 = vrot.slane %v4780_v42, %v1145_v46 }
0x10a6   :  { %v2499_v59 = vpop.f32.mrf.mxu0 }
0x10a7   :  { %v2500_v41 = vadd.f32 %v2993_v48, %v2499_v59  ;;  %3430 = vmatprep.mubr.msk.f32.mxu1 %vm1268_vm3, %v2508_v61  ;;  %v2511_v0 = vmax.f32 %v2505_v17, 0.0  ;;  %v2680_v17 = vrot.slane %v4780_v42, %v1153_v1 }
0x10a8   :  { %3431 = vmatmul.mubr.msk.f32.vlgmr.msra.gmra.mxu1 %vm1268_vm3, %v2509_v54 }
0x10a9   :  { %v2510_v62 = vmax.f32 %v2500_v41, 0.0 }
0x10ab   :  { %3433 = vmatprep.mubr.msk.f32.mxu1 %vm1268_vm3, %v2510_v62 }
0x10ac   :  { %3434 = vmatmul.mubr.msk.f32.gmra.mxu1 %vm1268_vm3, %v2511_v0 }
0x1168   :  { %v3432_v22 = vpop.f32.mrf.mxu1 }
0x1169   :  { %v2600_v47 = vadd.f32 %v3432_v22, %v2515_v31 }
0x116a   :  { %v2594_v8 = vpop.f32.mrf.mxu1 }
0x116b   :  { %v2614_v35 = vadd.f32 %v2600_v47, %v2404_v55  ;;  %v2595_v36 = vadd.f32 %v2594_v8, %v2515_v31 }
0x116c   :  { %v3435_v25 = vpop.f32.mrf.mxu1 }
0x116d   :  { %v2613_v10 = vadd.f32 %v2595_v36, %v2403_v57  ;;  %v2610_v18 = vadd.f32 %v3435_v25, %v2515_v31  ;;  %v2620_v7 = vsel %vm217_vm2, %v2614_v35, 0.0 }
0x116e   :  { %2621 = vadd.xlane.f32.xlu0 %v2620_v7  ;;  %v2604_v15 = vpop.f32.mrf.mxu1 }
0x116f   :  { %v2616_v49 = vadd.f32 %v2610_v18, %v2406_v53  ;;  %v2605_v37 = vadd.f32 %v2604_v15, %v2515_v31  ;;  %v2617_v23 = vsel %vm217_vm2, %v2613_v10, 0.0 }
0x1170   :  { %2618 = vadd.xlane.f32.xlu1 %v2617_v23 }
0x1171   :  { %v2615_v19 = vadd.f32 %v2605_v37, %v2405_v9  ;;  %v2626_v2 = vsel %vm217_vm2, %v2616_v49, 0.0 }
0x1172   :  { %2627 = vadd.xlane.f32.xlu0 %v2626_v2 }
0x1173   :  { %v2623_v26 = vsel %vm217_vm2, %v2615_v19, 0.0 }
0x1174   :  { %2624 = vadd.xlane.f32.xlu1 %v2623_v26 }
0x11f7   :  { %v2622_v60 = vpop.xlane.xlu0 %2621 }
0x11f8   :  { %v2630_v29 = vmul.f32 0.03125, %v2622_v60 }
0x11f9   :  { %v2619_v16 = vpop.xlane.xlu1 %2618 }
0x11fa   :  { %v2634_v28 = vsub.f32 %v2614_v35, %v2630_v29  ;;  %v2629_v11 = vmul.f32 0.03125, %v2619_v16 }
0x11fb   :  { %v2628_v20 = vpop.xlane.xlu0 %2627 }
0x11fc   :  { %v2633_v40 = vsub.f32 %v2613_v10, %v2629_v11  ;;  %v2632_v21 = vmul.f32 0.03125, %v2628_v20  ;;  %v2638_v30 = vmul.f32 %v2634_v28, %v2634_v28 }
0x11fd   :  { %v2625_v63 = vpop.xlane.xlu1 %2624 }
0x11fe   :  { %v2636_v52 = vsub.f32 %v2616_v49, %v2632_v21  ;;  %v2631_v33 = vmul.f32 0.03125, %v2625_v63  ;;  %v2644_v51 = vsel %vm217_vm2, %v2638_v30, 0.0  ;;  %v2637_v45 = vmul.f32 %v2633_v40, %v2633_v40 }
0x11ff   :  { %2645 = vadd.xlane.f32.xlu0 %v2644_v51 }
0x1200   :  { %v2635_v39 = vsub.f32 %v2615_v19, %v2631_v33  ;;  %v2641_v12 = vsel %vm217_vm2, %v2637_v45, 0.0  ;;  %v2640_v57 = vmul.f32 %v2636_v52, %v2636_v52  ;;  %v2756_v45 = vld [vmem:[%s4880_s5 + $0x18] sm:$0xff] }
0x1201   :  { %2642 = vadd.xlane.f32.xlu1 %v2641_v12  ;;  %3436 = vmatprep.subr.mxu0 %v2756_v45  ;;  %v2754_v12 = vld [vmem:[%s4880_s5 + $0x8] sm:$0xff] }
0x1202   :  { %v2650_v50 = vsel %vm217_vm2, %v2640_v57, 0.0  ;;  %v2639_v55 = vmul.f32 %v2635_v39, %v2635_v39  ;;  %3437 = vmatpush3.msra.mxu0 %v2756_v45  ;;  %v2753_v57 = vld [vmem:[%s4880_s5] sm:$0xff] }
0x1203   :  { %2651 = vadd.xlane.f32.xlu0 %v2650_v50 }
0x1204   :  { %v2647_v3 = vsel %vm217_vm2, %v2639_v55, 0.0 }
0x1205   :  { %2648 = vadd.xlane.f32.xlu1 %v2647_v3 }
0x1288   :  { %v2646_v34 = vpop.xlane.xlu0 %2645 }
0x1289   :  { %v2654_v9 = vmul.f32 0.03125, %v2646_v34 }
0x128a   :  { %v2643_v53 = vpop.xlane.xlu1 %2642 }
0x128b   :  { %v2658_v27 = vadd.f32 1e-05, %v2654_v9  ;;  %v2653_v6 = vmul.f32 0.03125, %v2643_v53 }
0x128c   :  { %v2652_v56 = vpop.xlane.xlu0 %2651 }
0x128d   :  { %3604 = vrsqrt.f32 %v2658_v27  ;;  %v2657_v44 = vadd.f32 1e-05, %v2653_v6  ;;  %v2656_v48 = vmul.f32 0.03125, %v2652_v56 }
0x128e   :  { %v2649_v14 = vpop.xlane.xlu1 %2648 }
0x128f   :  { %3606 = vrsqrt.f32 %v2657_v44  ;;  %v2660_v32 = vadd.f32 1e-05, %v2656_v48  ;;  %v2655_v58 = vmul.f32 0.03125, %v2649_v14 }
0x1291   :  { %3608 = vrsqrt.f32 %v2660_v32  ;;  %v2659_v13 = vadd.f32 1e-05, %v2655_v58  ;;  %v35_v32 = vld [vmem:[%s4873_s1 + $0x30] sm:$0x3] }
0x1293   :  { %3610 = vrsqrt.f32 %v2659_v13  ;;  %v2740_v13 = vrot.slane %v35_v32, %v1424_v4 }
0x129a   :  { %v3605_v61 = vpop.eup %3604 }
0x129b   :  { %v2666_v54 = vmul.f32 %v3605_v61, %v2634_v28 }
0x129c   :  { %v3607_v59 = vpop.eup %3606 }
0x129d   :  { %v2674_v41 = vmul.f32 %v2672_v38, %v2666_v54  ;;  %v2665_v62 = vmul.f32 %v3607_v59, %v2633_v40  ;;  %v2748_v59 = vrot.slane %v35_v32, %v1432_v24 }
0x129e   :  { %v3609_v0 = vpop.eup %3608 }
0x129f   :  { %v2682_v5 = vadd.f32 %v2680_v17, %v2674_v41  ;;  %v2673_v31 = vmul.f32 %v2672_v38, %v2665_v62  ;;  %v2668_v22 = vmul.f32 %v3609_v0, %v2636_v52 }
0x12a0   :  { %v3611_v47 = vpop.eup %3610 }
0x12a1   :  { %v2688_v8 = vsel %vm217_vm2, %v2682_v5, 0.0  ;;  %v2681_v35 = vadd.f32 %v2680_v17, %v2673_v31  ;;  %v2676_v36 = vmul.f32 %v2672_v38, %v2668_v22  ;;  %v2667_v25 = vmul.f32 %v3611_v47, %v2635_v39  ;;  %v2755_v39 = vld [vmem:[%s4880_s5 + $0x10] sm:$0xff] }
0x12a2   :  { %2689 = vadd.xlane.f32.xlu0 %v2688_v8  ;;  %3438 = vmatprep.subr.mxu0 %v2755_v39 }
0x12a3   :  { %v2685_v46 = vsel %vm217_vm2, %v2681_v35, 0.0  ;;  %v2684_v10 = vadd.f32 %v2680_v17, %v2676_v36  ;;  %v2675_v18 = vmul.f32 %v2672_v38, %v2667_v25  ;;  %3439 = vmatpush3.msra.mxu0 %v2755_v39 }
0x12a4   :  { %2686 = vadd.xlane.f32.xlu1 %v2685_v46  ;;  %3440 = vmatprep.subr.mxu0 %v2754_v12 }
0x12a5   :  { %v2694_v1 = vsel %vm217_vm2, %v2684_v10, 0.0  ;;  %v2683_v42 = vadd.f32 %v2680_v17, %v2675_v18  ;;  %3441 = vmatpush3.msra.mxu0 %v2754_v12 }
0x12a6   :  { %2695 = vadd.xlane.f32.xlu0 %v2694_v1  ;;  %3442 = vmatprep.subr.mxu0 %v2753_v57 }
0x12a7   :  { %v2691_v7 = vsel %vm217_vm2, %v2683_v42, 0.0  ;;  %3443 = vmatpush3.msra.mxu0 %v2753_v57 }
0x12a8   :  { %2692 = vadd.xlane.f32.xlu1 %v2691_v7 }
0x132b   :  { %v2690_v15 = vpop.xlane.xlu0 %2689 }
0x132c   :  { %v2698_v49 = vmul.f32 0.03125, %v2690_v15 }
0x132d   :  { %v2687_v37 = vpop.xlane.xlu1 %2686 }
0x132e   :  { %v2702_v23 = vsub.f32 %v2682_v5, %v2698_v49  ;;  %v2697_v19 = vmul.f32 0.03125, %v2687_v37 }
0x132f   :  { %v2696_v2 = vpop.xlane.xlu0 %2695 }
0x1330   :  { %v2701_v26 = vsub.f32 %v2681_v35, %v2697_v19  ;;  %v2700_v60 = vmul.f32 0.03125, %v2696_v2  ;;  %v2706_v29 = vmul.f32 %v2702_v23, %v2702_v23 }
0x1331   :  { %v2693_v16 = vpop.xlane.xlu1 %2692 }
0x1332   :  { %v2704_v28 = vsub.f32 %v2684_v10, %v2700_v60  ;;  %v2699_v11 = vmul.f32 0.03125, %v2693_v16  ;;  %v2712_v20 = vsel %vm217_vm2, %v2706_v29, 0.0  ;;  %v2705_v40 = vmul.f32 %v2701_v26, %v2701_v26 }
0x1333   :  { %2713 = vadd.xlane.f32.xlu0 %v2712_v20 }
0x1334   :  { %v2703_v21 = vsub.f32 %v2683_v42, %v2699_v11  ;;  %v2709_v30 = vsel %vm217_vm2, %v2705_v40, 0.0  ;;  %v2708_v63 = vmul.f32 %v2704_v28, %v2704_v28 }
0x1335   :  { %2710 = vadd.xlane.f32.xlu1 %v2709_v30 }
0x1336   :  { %v2718_v52 = vsel %vm217_vm2, %v2708_v63, 0.0  ;;  %v2707_v33 = vmul.f32 %v2703_v21, %v2703_v21 }
0x1337   :  { %2719 = vadd.xlane.f32.xlu0 %v2718_v52 }
0x1338   :  { %v2715_v51 = vsel %vm217_vm2, %v2707_v33, 0.0 }
0x1339   :  { %2716 = vadd.xlane.f32.xlu1 %v2715_v51 }
0x13bc   :  { %v2714_v50 = vpop.xlane.xlu0 %2713 }
0x13bd   :  { %v2722_v55 = vmul.f32 0.03125, %v2714_v50 }
0x13be   :  { %v2711_v3 = vpop.xlane.xlu1 %2710 }
0x13bf   :  { %v2726_v34 = vadd.f32 1e-05, %v2722_v55  ;;  %v2721_v9 = vmul.f32 0.03125, %v2711_v3 }
0x13c0   :  { %v2720_v53 = vpop.xlane.xlu0 %2719 }
0x13c1   :  { %3612 = vrsqrt.f32 %v2726_v34  ;;  %v2725_v27 = vadd.f32 1e-05, %v2721_v9  ;;  %v2724_v6 = vmul.f32 0.03125, %v2720_v53 }
0x13c2   :  { %v2717_v56 = vpop.xlane.xlu1 %2716 }
0x13c3   :  { %3614 = vrsqrt.f32 %v2725_v27  ;;  %v2728_v44 = vadd.f32 1e-05, %v2724_v6  ;;  %v2723_v48 = vmul.f32 0.03125, %v2717_v56 }
0x13c5   :  { %3616 = vrsqrt.f32 %v2728_v44  ;;  %v2727_v14 = vadd.f32 1e-05, %v2723_v48 }
0x13c7   :  { %3618 = vrsqrt.f32 %v2727_v14 }
0x13ce   :  { %v3613_v58 = vpop.eup %3612 }
0x13cf   :  { %v2734_v38 = vmul.f32 %v3613_v58, %v2702_v23 }
0x13d0   :  { %v3615_v61 = vpop.eup %3614 }
0x13d1   :  { %v2733_v54 = vmul.f32 %v3615_v61, %v2701_v26  ;;  %v2742_v41 = vmul.f32 %v2740_v13, %v2734_v38 }
0x13d2   :  { %v3617_v17 = vpop.eup %3616 }
0x13d3   :  { %v2741_v62 = vmul.f32 %v2740_v13, %v2733_v54  ;;  %v2736_v0 = vmul.f32 %v3617_v17, %v2704_v28  ;;  %v2750_v47 = vadd.f32 %v2748_v59, %v2742_v41 }
0x13d4   :  { %v3619_v5 = vpop.eup %3618 }
0x13d5   :  { %v2749_v31 = vadd.f32 %v2748_v59, %v2741_v62  ;;  %v2735_v22 = vmul.f32 %v3619_v5, %v2703_v21  ;;  %v2744_v8 = vmul.f32 %v2740_v13, %v2736_v0 }
0x13d7   :  { %3444 = vmatprep.mubr.msk.f32.mxu0 %vm217_vm2, %v2749_v31  ;;  %v2743_v35 = vmul.f32 %v2740_v13, %v2735_v22  ;;  %v2752_v36 = vadd.f32 %v2748_v59, %v2744_v8 }
0x13d8   :  { %3445 = vmatmul.mubr.msk.f32.vlgmr.msra.gmra.mxu0 %vm217_vm2, %v2750_v47 }
0x13d9   :  { %v2751_v4 = vadd.f32 %v2748_v59, %v2743_v35 }
0x13db   :  { %3447 = vmatprep.mubr.msk.f32.mxu0 %vm217_vm2, %v2751_v4 }
0x13dc   :  { %3448 = vmatmul.mubr.msk.f32.gmra.mxu0 %vm217_vm2, %v2752_v36 }
0x1498   :  { %v3446_v24 = vpop.f32.mrf.mxu0 }
0x1499   :  { %v2846_v25 = vadd.f32 %v3446_v24, %v3002_v43 }
0x149a   :  { %v2840_v46 = vpop.f32.mrf.mxu0 }
0x149b   :  { %2860 = vst [vmem:[%s4881_s8 + $0x8] sm:$0xff] %v2846_v25  ;;  %v2841_v10 = vadd.f32 %v3002_v43, %v2840_v46 }
0x149c   :  { %v3449_v18 = vpop.f32.mrf.mxu0 }
0x149d   :  { %2859 = vst [vmem:[%s4881_s8] sm:$0xff] %v2841_v10  ;;  %v2856_v1 = vadd.f32 %v3449_v18, %v3002_v43 }
0x149e   :  { %v2850_v42 = vpop.f32.mrf.mxu0 }
0x149f   :  { %2862 = vst [vmem:[%s4881_s8 + $0x18] sm:$0xff] %v2856_v1  ;;  %v2851_v7 = vadd.f32 %v3002_v43, %v2850_v42 }
0x14a1   :  { %2861 = vst [vmem:[%s4881_s8 + $0x10] sm:$0xff] %v2851_v7 }

</bundles_post_ra>
